<compile_context>
chip_gen: v7x
topology: tpu7x:2x2x1
jax: 0.10.0
libtpu: 0.0.40
codegen_flags: <defaults>
</compile_context>

<pallas_src>
import math

import jax
import jax.numpy as jnp
from jax.experimental import pallas as pl
from jax.experimental.pallas import tpu as pltpu


# ----------------------------- kernel ---------------------------------------

def _layernorm(x, w, b, eps=1e-5):
    m = jnp.mean(x, axis=-1, keepdims=True)
    c = x - m
    v = jnp.mean(c * c, axis=-1, keepdims=True)
    return c * jax.lax.rsqrt(v + eps) * w + b


def _make_kernel(*, batch, seq, heads, d_model, num_layers):
    n_rows = batch * seq
    dh = d_model // heads
    attn_scale = 1.0 / math.sqrt(dh)
    emb_scale = math.sqrt(d_model)

    def kernel(src_ref, pe_ref, emb_w1_ref, emb_b1_ref, emb_w2_ref, emb_b2_ref,
               qkv_w_ref, qkv_b_ref, out_w_ref, out_b_ref, ln_ref,
               ff_w1_ref, ff_b1_ref, ff_w2_ref, ff_b2_ref,
               lin_w_ref, lin_b_ref, out_ref):
        x0 = src_ref[...]                                              # [N, Fin]

        # --- FCEmbedding: Linear -> ReLU -> Linear (frame-wise MLP) ---
        h = jnp.maximum(
            jnp.dot(x0, emb_w1_ref[...], preferred_element_type=jnp.float32)
            + emb_b1_ref[...], 0.0)
        x = (jnp.dot(h, emb_w2_ref[...], preferred_element_type=jnp.float32)
             + emb_b2_ref[...])                                        # [N, D]

        # scale + positional encoding (dropout == identity in eval)
        x = x * emb_scale + pe_ref[...]

        # Per-head column mask [H, D]: 1 where column d belongs to head h.
        hid = jax.lax.broadcasted_iota(jnp.int32, (heads, d_model), 0)
        did = jax.lax.broadcasted_iota(jnp.int32, (heads, d_model), 1)
        head_mask = ((did >= hid * dh) & (did < (hid + 1) * dh)).astype(jnp.float32)
        mask4 = head_mask[:, None, None, :]                            # [H,1,1,D]

        g = heads * batch
        for l in range(num_layers):
            # --- multi-head self-attention (all heads fused, post-norm) ---
            q = (jnp.dot(x, qkv_w_ref[l, 0], preferred_element_type=jnp.float32)
                 + qkv_b_ref[l, 0]).reshape(batch, seq, d_model)
            k = (jnp.dot(x, qkv_w_ref[l, 1], preferred_element_type=jnp.float32)
                 + qkv_b_ref[l, 1]).reshape(batch, seq, d_model)
            v = (jnp.dot(x, qkv_w_ref[l, 2], preferred_element_type=jnp.float32)
                 + qkv_b_ref[l, 2]).reshape(batch, seq, d_model)

            qm = (q[None] * mask4).reshape(g, seq, d_model)            # head-masked q
            vm = (v[None] * mask4).reshape(g, seq, d_model)            # head-masked v
            kb = jnp.broadcast_to(
                k[None], (heads, batch, seq, d_model)).reshape(g, seq, d_model)

            s = jnp.einsum('gqd,gkd->gqk', qm, kb,
                           preferred_element_type=jnp.float32) * attn_scale
            s = s - jnp.max(s, axis=-1, keepdims=True)
            p = jnp.exp(s)
            p = p * pl.reciprocal(jnp.sum(p, axis=-1, keepdims=True), approx=True)

            o = jnp.einsum('gqk,gkd->gqd', p, vm,
                           preferred_element_type=jnp.float32)         # [H*B, S, D]
            # masked-column contributions sum to the standard head concat
            o = o.reshape(heads, batch, seq, d_model).sum(axis=0)      # [B, S, D]
            o = o.reshape(n_rows, d_model)                             # [N, D]

            attn = (jnp.dot(o, out_w_ref[l], preferred_element_type=jnp.float32)
                    + out_b_ref[l])
            x = _layernorm(x + attn, ln_ref[l, 0], ln_ref[l, 1])

            # --- feed-forward ---
            ff = jnp.maximum(
                jnp.dot(x, ff_w1_ref[l], preferred_element_type=jnp.float32)
                + ff_b1_ref[l], 0.0)
            ff = (jnp.dot(ff, ff_w2_ref[l], preferred_element_type=jnp.float32)
                  + ff_b2_ref[l])
            x = _layernorm(x + ff, ln_ref[l, 2], ln_ref[l, 3])

        # --- mean pooling over sequence as an MXU matmul ---
        rid = jax.lax.broadcasted_iota(jnp.int32, (batch, n_rows), 0)
        cid = jax.lax.broadcasted_iota(jnp.int32, (batch, n_rows), 1)
        pool = jnp.where((cid >= rid * seq) & (cid < (rid + 1) * seq),
                         1.0 / seq, 0.0).astype(jnp.float32)           # [B, N]
        pooled = jnp.dot(pool, x, preferred_element_type=jnp.float32)  # [B, D]

        # --- classifier (lane-dense, padded to 128 columns) ---
        out_ref[...] = (jnp.dot(pooled, lin_w_ref[...],
                                preferred_element_type=jnp.float32)
                        + lin_b_ref[...])

    return kernel


# ----------------------------- wrapper ---------------------------------------

def transformer_forward(src, params, *, input_size, heads, num_layers):
    B, L = src.shape
    S = L // input_size
    N = B * S
    d_model = params["emb_w2"].shape[-1]
    num_classes = params["lin_w"].shape[-1]
    c_pad = ((num_classes + 127) // 128) * 128

    # frame the waveform and fold batch into rows (single grid step)
    src2 = src.reshape(N, input_size).astype(jnp.float32)
    pe_t = jnp.tile(params["pe"][:S], (B, 1))                          # [N, D]

    # lane-dense (128-wide) classifier weights; sliced back after the call
    lin_w_p = jnp.zeros((d_model, c_pad), jnp.float32)
    lin_w_p = lin_w_p.at[:, :num_classes].set(params["lin_w"])
    lin_b_p = jnp.zeros((1, c_pad), jnp.float32)
    lin_b_p = lin_b_p.at[:, :num_classes].set(params["lin_b"])

    inputs = [src2, pe_t,
              params["emb_w1"], params["emb_b1"], params["emb_w2"], params["emb_b2"],
              params["qkv_w"], params["qkv_b"], params["out_w"], params["out_b"],
              params["ln"],
              params["ff_w1"], params["ff_b1"], params["ff_w2"], params["ff_b2"],
              lin_w_p, lin_b_p]

    in_specs = [pl.BlockSpec(a.shape, lambda i, nd=a.ndim: (0,) * nd) for a in inputs]

    kernel = _make_kernel(batch=B, seq=S, heads=heads, d_model=d_model,
                          num_layers=num_layers)

    out = pl.pallas_call(
        kernel,
        out_shape=jax.ShapeDtypeStruct((B, c_pad), jnp.float32),
        grid=(1,),
        in_specs=in_specs,
        out_specs=pl.BlockSpec((B, c_pad), lambda i: (0, 0)),
        compiler_params=pltpu.CompilerParams(
            dimension_semantics=("arbitrary",),
            vmem_limit_bytes=32 * 1024 * 1024),
    )(*inputs)
    return out[:, :num_classes]


# ----------------------------- parameters ------------------------------------

def init_params(key, *, input_size, embedding_hidden, d_model, ff_hidden,
                num_layers, num_classes, seq_len):
    keys = iter(jax.random.split(key, 16))

    def u(shape, scale=0.1):
        return jax.random.uniform(next(keys), shape, jnp.float32, -scale, scale)

    # sinusoidal positional encoding [S, D]
    position = jnp.arange(seq_len, dtype=jnp.float32)[:, None]
    div_term = jnp.exp(jnp.arange(0, d_model, 2, dtype=jnp.float32)
                       * (-math.log(10000.0) / d_model))
    pe = jnp.zeros((seq_len, d_model), jnp.float32)
    pe = pe.at[:, 0::2].set(jnp.sin(position * div_term))
    pe = pe.at[:, 1::2].set(jnp.cos(position * div_term))

    # LayerNorm params stacked per layer: [ln1_w, ln1_b, ln2_w, ln2_b]
    ln_single = jnp.stack([jnp.ones((1, d_model), jnp.float32),
                           jnp.zeros((1, d_model), jnp.float32),
                           jnp.ones((1, d_model), jnp.float32),
                           jnp.zeros((1, d_model), jnp.float32)], axis=0)
    ln = jnp.tile(ln_single[None], (num_layers, 1, 1, 1))              # [L,4,1,D]

    params = {
        "pe": pe,
        "emb_w1": u((input_size, embedding_hidden)),
        "emb_b1": u((1, embedding_hidden)),
        "emb_w2": u((embedding_hidden, d_model)),
        "emb_b2": u((1, d_model)),
        # per-layer weights stacked; matrices pre-transposed so kernel does x @ W
        "qkv_w": u((num_layers, 3, d_model, d_model)),   # q/k/v projections
        "qkv_b": u((num_layers, 3, 1, d_model)),
        "out_w": u((num_layers, d_model, d_model)),
        "out_b": u((num_layers, 1, d_model)),
        "ln": ln,
        "ff_w1": u((num_layers, d_model, ff_hidden)),
        "ff_b1": u((num_layers, 1, ff_hidden)),
        "ff_w2": u((num_layers, ff_hidden, d_model)),
        "ff_b2": u((num_layers, 1, d_model)),
        "lin_w": u((d_model, num_classes)),              # init_weights: uniform(-0.1, 0.1)
        "lin_b": jnp.zeros((1, num_classes), jnp.float32),  # init_weights: zero
    }
    return params


# ----------------------------- main -------------------------------------------

if __name__ == "__main__":
    # small, module-consistent shapes
    B = 2
    INPUT_SIZE = 16          # frame size consumed by FCEmbedding
    EMB_HIDDEN = 32
    D_MODEL = 32             # hidden_vector_size
    HEADS = 4
    FF_HIDDEN = 64           # hidden_layer_size
    LAYERS = 2
    NUM_CLASSES = 4
    SEQ = 8
    L = SEQ * INPUT_SIZE     # waveform_length = 128

    key = jax.random.PRNGKey(0)
    k_src, k_par = jax.random.split(key)
    src = jax.random.normal(k_src, (B, L), jnp.float32)

    params = init_params(k_par, input_size=INPUT_SIZE, embedding_hidden=EMB_HIDDEN,
                         d_model=D_MODEL, ff_hidden=FF_HIDDEN, num_layers=LAYERS,
                         num_classes=NUM_CLASSES, seq_len=SEQ)

    out = transformer_forward(src, params, input_size=INPUT_SIZE,
                              heads=HEADS, num_layers=LAYERS)
    out = jax.block_until_ready(out)
    assert out.shape == (B, NUM_CLASSES), out.shape
    assert jnp.all(jnp.isfinite(out))
    print("KERNEL_OK")
</pallas_src>

<mosaic_0001>
module attributes {stable_mosaic.version = 11 : i64} {
  func.func @kernel(%arg0: i32, %arg1: memref<16x16xf32, #tpu.memory_space<vmem>>, %arg2: memref<16x32xf32, #tpu.memory_space<vmem>>, %arg3: memref<16x32xf32, #tpu.memory_space<vmem>>, %arg4: memref<1x32xf32, #tpu.memory_space<vmem>>, %arg5: memref<32x32xf32, #tpu.memory_space<vmem>>, %arg6: memref<1x32xf32, #tpu.memory_space<vmem>>, %arg7: memref<2x3x32x32xf32, #tpu.memory_space<vmem>>, %arg8: memref<2x3x1x32xf32, #tpu.memory_space<vmem>>, %arg9: memref<2x32x32xf32, #tpu.memory_space<vmem>>, %arg10: memref<2x1x32xf32, #tpu.memory_space<vmem>>, %arg11: memref<2x4x1x32xf32, #tpu.memory_space<vmem>>, %arg12: memref<2x32x64xf32, #tpu.memory_space<vmem>>, %arg13: memref<2x1x64xf32, #tpu.memory_space<vmem>>, %arg14: memref<2x64x32xf32, #tpu.memory_space<vmem>>, %arg15: memref<2x1x32xf32, #tpu.memory_space<vmem>>, %arg16: memref<32x128xf32, #tpu.memory_space<vmem>>, %arg17: memref<1x128xf32, #tpu.memory_space<vmem>>, %arg18: memref<2x128xf32, #tpu.memory_space<vmem>>) attributes {dimension_semantics = [#tpu.dimension_semantics<arbitrary>], iteration_bounds = array<i64: 1>, scalar_prefetch = 0 : i64, scratch_operands = 0 : i64, tpu.core_type = #tpu.core_type<tc>, window_params = [{pipeline_mode = #tpu.pipeline_mode<synchronous>, transform_indices = @transform_0, window_bounds = array<i64: 16, 16>}, {pipeline_mode = #tpu.pipeline_mode<synchronous>, transform_indices = @transform_1, window_bounds = array<i64: 16, 32>}, {pipeline_mode = #tpu.pipeline_mode<synchronous>, transform_indices = @transform_2, window_bounds = array<i64: 16, 32>}, {pipeline_mode = #tpu.pipeline_mode<synchronous>, transform_indices = @transform_3, window_bounds = array<i64: 1, 32>}, {pipeline_mode = #tpu.pipeline_mode<synchronous>, transform_indices = @transform_4, window_bounds = array<i64: 32, 32>}, {pipeline_mode = #tpu.pipeline_mode<synchronous>, transform_indices = @transform_5, window_bounds = array<i64: 1, 32>}, {pipeline_mode = #tpu.pipeline_mode<synchronous>, transform_indices = @transform_6, window_bounds = array<i64: 2, 3, 32, 32>}, {pipeline_mode = #tpu.pipeline_mode<synchronous>, transform_indices = @transform_7, window_bounds = array<i64: 2, 3, 1, 32>}, {pipeline_mode = #tpu.pipeline_mode<synchronous>, transform_indices = @transform_8, window_bounds = array<i64: 2, 32, 32>}, {pipeline_mode = #tpu.pipeline_mode<synchronous>, transform_indices = @transform_9, window_bounds = array<i64: 2, 1, 32>}, {pipeline_mode = #tpu.pipeline_mode<synchronous>, transform_indices = @transform_10, window_bounds = array<i64: 2, 4, 1, 32>}, {pipeline_mode = #tpu.pipeline_mode<synchronous>, transform_indices = @transform_11, window_bounds = array<i64: 2, 32, 64>}, {pipeline_mode = #tpu.pipeline_mode<synchronous>, transform_indices = @transform_12, window_bounds = array<i64: 2, 1, 64>}, {pipeline_mode = #tpu.pipeline_mode<synchronous>, transform_indices = @transform_13, window_bounds = array<i64: 2, 64, 32>}, {pipeline_mode = #tpu.pipeline_mode<synchronous>, transform_indices = @transform_14, window_bounds = array<i64: 2, 1, 32>}, {pipeline_mode = #tpu.pipeline_mode<synchronous>, transform_indices = @transform_15, window_bounds = array<i64: 32, 128>}, {pipeline_mode = #tpu.pipeline_mode<synchronous>, transform_indices = @transform_16, window_bounds = array<i64: 1, 128>}, {pipeline_mode = #tpu.pipeline_mode<synchronous>, transform_indices = @transform_17, window_bounds = array<i64: 2, 128>}]} {
    %c0 = arith.constant 0 : index
    %c0_0 = arith.constant 0 : index
    %0 = vector.load %arg1[%c0, %c0_0] : memref<16x16xf32, #tpu.memory_space<vmem>>, vector<16x16xf32>
    %c0_1 = arith.constant 0 : index
    %c0_2 = arith.constant 0 : index
    %1 = vector.load %arg3[%c0_1, %c0_2] : memref<16x32xf32, #tpu.memory_space<vmem>>, vector<16x32xf32>
    %cst = arith.constant dense<0.000000e+00> : vector<16x32xf32>
    %2 = tpu.matmul %0, %1, %cst {dimension_numbers = #tpu.dot_dimension_numbers<[1], [0], [0], [1], [0, 0, 1, 1], [], []>} : vector<16x16xf32>, vector<16x32xf32>, vector<16x32xf32> -> vector<16x32xf32>
    %c0_3 = arith.constant 0 : index
    %c0_4 = arith.constant 0 : index
    %3 = vector.load %arg4[%c0_3, %c0_4] : memref<1x32xf32, #tpu.memory_space<vmem>>, vector<1x32xf32>
    %4 = vector.broadcast %3 : vector<1x32xf32> to vector<16x32xf32>
    %5 = arith.addf %2, %4 : vector<16x32xf32>
    %cst_5 = arith.constant 0.000000e+00 : f32
    %6 = vector.broadcast %cst_5 : f32 to vector<16x32xf32>
    %7 = arith.maximumf %5, %6 : vector<16x32xf32>
    %c0_6 = arith.constant 0 : index
    %c0_7 = arith.constant 0 : index
    %8 = vector.load %arg5[%c0_6, %c0_7] : memref<32x32xf32, #tpu.memory_space<vmem>>, vector<32x32xf32>
    %cst_8 = arith.constant dense<0.000000e+00> : vector<16x32xf32>
    %9 = tpu.matmul %7, %8, %cst_8 {dimension_numbers = #tpu.dot_dimension_numbers<[1], [0], [0], [1], [0, 0, 1, 1], [], []>} : vector<16x32xf32>, vector<32x32xf32>, vector<16x32xf32> -> vector<16x32xf32>
    %c0_9 = arith.constant 0 : index
    %c0_10 = arith.constant 0 : index
    %10 = vector.load %arg6[%c0_9, %c0_10] : memref<1x32xf32, #tpu.memory_space<vmem>>, vector<1x32xf32>
    %11 = vector.broadcast %10 : vector<1x32xf32> to vector<16x32xf32>
    %12 = arith.addf %9, %11 : vector<16x32xf32>
    %cst_11 = arith.constant 5.65685415 : f32
    %13 = vector.broadcast %cst_11 : f32 to vector<16x32xf32>
    %14 = arith.mulf %12, %13 : vector<16x32xf32>
    %c0_12 = arith.constant 0 : index
    %c0_13 = arith.constant 0 : index
    %15 = vector.load %arg2[%c0_12, %c0_13] : memref<16x32xf32, #tpu.memory_space<vmem>>, vector<16x32xf32>
    %16 = arith.addf %14, %15 : vector<16x32xf32>
    %17 = tpu.iota {dimensions = array<i32: 0>} : vector<4x32xi32>
    %18 = tpu.iota {dimensions = array<i32: 1>} : vector<4x32xi32>
    %c8_i32 = arith.constant 8 : i32
    %19 = vector.broadcast %c8_i32 : i32 to vector<4x32xi32>
    %20 = arith.muli %17, %19 : vector<4x32xi32>
    %21 = arith.cmpi sge, %18, %20 : vector<4x32xi32>
    %c1_i32 = arith.constant 1 : i32
    %22 = vector.broadcast %c1_i32 : i32 to vector<4x32xi32>
    %23 = arith.addi %17, %22 : vector<4x32xi32>
    %c8_i32_14 = arith.constant 8 : i32
    %24 = vector.broadcast %c8_i32_14 : i32 to vector<4x32xi32>
    %25 = arith.muli %23, %24 : vector<4x32xi32>
    %26 = arith.cmpi slt, %18, %25 : vector<4x32xi32>
    %27 = arith.andi %21, %26 : vector<4x32xi1>
    %28 = arith.extui %27 : vector<4x32xi1> to vector<4x32xi32>
    %29 = arith.sitofp %28 : vector<4x32xi32> to vector<4x32xf32>
    %30 = vector.shape_cast %29 : vector<4x32xf32> to vector<4x1x1x32xf32>
    %c0_15 = arith.constant 0 : index
    %c0_16 = arith.constant 0 : index
    %c0_17 = arith.constant 0 : index
    %c0_18 = arith.constant 0 : index
    %31 = vector.load %arg7[%c0_15, %c0_16, %c0_17, %c0_18] : memref<2x3x32x32xf32, #tpu.memory_space<vmem>>, vector<1x1x32x32xf32>
    %32 = vector.shape_cast %31 : vector<1x1x32x32xf32> to vector<32x32xf32>
    %cst_19 = arith.constant dense<0.000000e+00> : vector<16x32xf32>
    %33 = tpu.matmul %16, %32, %cst_19 {dimension_numbers = #tpu.dot_dimension_numbers<[1], [0], [0], [1], [0, 0, 1, 1], [], []>} : vector<16x32xf32>, vector<32x32xf32>, vector<16x32xf32> -> vector<16x32xf32>
    %c0_20 = arith.constant 0 : index
    %c0_21 = arith.constant 0 : index
    %c0_22 = arith.constant 0 : index
    %c0_23 = arith.constant 0 : index
    %34 = vector.load %arg8[%c0_20, %c0_21, %c0_22, %c0_23] : memref<2x3x1x32xf32, #tpu.memory_space<vmem>>, vector<1x1x1x32xf32>
    %35 = vector.shape_cast %34 : vector<1x1x1x32xf32> to vector<1x32xf32>
    %36 = vector.broadcast %35 : vector<1x32xf32> to vector<16x32xf32>
    %37 = arith.addf %33, %36 : vector<16x32xf32>
    %38 = vector.shape_cast %37 : vector<16x32xf32> to vector<2x8x32xf32>
    %c0_24 = arith.constant 0 : index
    %c1 = arith.constant 1 : index
    %c0_25 = arith.constant 0 : index
    %c0_26 = arith.constant 0 : index
    %39 = vector.load %arg7[%c0_24, %c1, %c0_25, %c0_26] : memref<2x3x32x32xf32, #tpu.memory_space<vmem>>, vector<1x1x32x32xf32>
    %40 = vector.shape_cast %39 : vector<1x1x32x32xf32> to vector<32x32xf32>
    %cst_27 = arith.constant dense<0.000000e+00> : vector<16x32xf32>
    %41 = tpu.matmul %16, %40, %cst_27 {dimension_numbers = #tpu.dot_dimension_numbers<[1], [0], [0], [1], [0, 0, 1, 1], [], []>} : vector<16x32xf32>, vector<32x32xf32>, vector<16x32xf32> -> vector<16x32xf32>
    %c0_28 = arith.constant 0 : index
    %c1_29 = arith.constant 1 : index
    %c0_30 = arith.constant 0 : index
    %c0_31 = arith.constant 0 : index
    %42 = vector.load %arg8[%c0_28, %c1_29, %c0_30, %c0_31] : memref<2x3x1x32xf32, #tpu.memory_space<vmem>>, vector<1x1x1x32xf32>
    %43 = vector.shape_cast %42 : vector<1x1x1x32xf32> to vector<1x32xf32>
    %44 = vector.broadcast %43 : vector<1x32xf32> to vector<16x32xf32>
    %45 = arith.addf %41, %44 : vector<16x32xf32>
    %46 = vector.shape_cast %45 : vector<16x32xf32> to vector<2x8x32xf32>
    %c0_32 = arith.constant 0 : index
    %c2 = arith.constant 2 : index
    %c0_33 = arith.constant 0 : index
    %c0_34 = arith.constant 0 : index
    %47 = vector.load %arg7[%c0_32, %c2, %c0_33, %c0_34] : memref<2x3x32x32xf32, #tpu.memory_space<vmem>>, vector<1x1x32x32xf32>
    %48 = vector.shape_cast %47 : vector<1x1x32x32xf32> to vector<32x32xf32>
    %cst_35 = arith.constant dense<0.000000e+00> : vector<16x32xf32>
    %49 = tpu.matmul %16, %48, %cst_35 {dimension_numbers = #tpu.dot_dimension_numbers<[1], [0], [0], [1], [0, 0, 1, 1], [], []>} : vector<16x32xf32>, vector<32x32xf32>, vector<16x32xf32> -> vector<16x32xf32>
    %c0_36 = arith.constant 0 : index
    %c2_37 = arith.constant 2 : index
    %c0_38 = arith.constant 0 : index
    %c0_39 = arith.constant 0 : index
    %50 = vector.load %arg8[%c0_36, %c2_37, %c0_38, %c0_39] : memref<2x3x1x32xf32, #tpu.memory_space<vmem>>, vector<1x1x1x32xf32>
    %51 = vector.shape_cast %50 : vector<1x1x1x32xf32> to vector<1x32xf32>
    %52 = vector.broadcast %51 : vector<1x32xf32> to vector<16x32xf32>
    %53 = arith.addf %49, %52 : vector<16x32xf32>
    %54 = vector.shape_cast %53 : vector<16x32xf32> to vector<2x8x32xf32>
    %55 = vector.shape_cast %38 : vector<2x8x32xf32> to vector<1x2x8x32xf32>
    %56 = vector.broadcast %55 : vector<1x2x8x32xf32> to vector<4x2x8x32xf32>
    %57 = vector.broadcast %30 : vector<4x1x1x32xf32> to vector<4x2x8x32xf32>
    %58 = arith.mulf %56, %57 : vector<4x2x8x32xf32>
    %59 = vector.shape_cast %58 : vector<4x2x8x32xf32> to vector<8x8x32xf32>
    %60 = vector.shape_cast %54 : vector<2x8x32xf32> to vector<1x2x8x32xf32>
    %61 = vector.broadcast %60 : vector<1x2x8x32xf32> to vector<4x2x8x32xf32>
    %62 = vector.broadcast %30 : vector<4x1x1x32xf32> to vector<4x2x8x32xf32>
    %63 = arith.mulf %61, %62 : vector<4x2x8x32xf32>
    %64 = vector.shape_cast %63 : vector<4x2x8x32xf32> to vector<8x8x32xf32>
    %65 = vector.shape_cast %46 : vector<2x8x32xf32> to vector<1x2x8x32xf32>
    %66 = vector.shape_cast %65 : vector<1x2x8x32xf32> to vector<1x2x8x32xf32>
    %67 = vector.broadcast %66 : vector<1x2x8x32xf32> to vector<4x2x8x32xf32>
    %68 = vector.shape_cast %67 : vector<4x2x8x32xf32> to vector<8x8x32xf32>
    "tpu.trace_start"() <{level = 10 : i32, message = "gqd,gkd->gqk"}> : () -> ()
    %cst_40 = arith.constant dense<0.000000e+00> : vector<8x8x8xf32>
    %69 = tpu.matmul %59, %68, %cst_40 {dimension_numbers = #tpu.dot_dimension_numbers<[2], [2], [1], [1], [0, 0, 0, 1, 1, 1], [0], [0]>} : vector<8x8x32xf32>, vector<8x8x32xf32>, vector<8x8x8xf32> -> vector<8x8x8xf32>
    "tpu.trace_stop"() : () -> ()
    %cst_41 = arith.constant 0.353553385 : f32
    %70 = vector.broadcast %cst_41 : f32 to vector<8x8x8xf32>
    %71 = arith.mulf %69, %70 : vector<8x8x8xf32>
    %cst_42 = arith.constant dense<0xFF800000> : vector<8x8xf32>
    %72 = vector.multi_reduction <maximumf>, %71, %cst_42 [2] : vector<8x8x8xf32> to vector<8x8xf32>
    %73 = vector.shape_cast %72 : vector<8x8xf32> to vector<8x8x1xf32>
    %74 = vector.broadcast %73 : vector<8x8x1xf32> to vector<8x8x8xf32>
    %75 = arith.subf %71, %74 : vector<8x8x8xf32>
    %76 = math.exp %75 : vector<8x8x8xf32>
    %cst_43 = arith.constant dense<0.000000e+00> : vector<8x8xf32>
    %77 = vector.multi_reduction <add>, %76, %cst_43 [2] : vector<8x8x8xf32> to vector<8x8xf32>
    %78 = vector.shape_cast %77 : vector<8x8xf32> to vector<8x8x1xf32>
    %79 = tpu.reciprocal %78 {approx = true} : vector<8x8x1xf32> -> vector<8x8x1xf32>
    %80 = vector.broadcast %79 : vector<8x8x1xf32> to vector<8x8x8xf32>
    %81 = arith.mulf %76, %80 : vector<8x8x8xf32>
    "tpu.trace_start"() <{level = 10 : i32, message = "gqk,gkd->gqd"}> : () -> ()
    %cst_44 = arith.constant dense<0.000000e+00> : vector<8x8x32xf32>
    %82 = tpu.matmul %81, %64, %cst_44 {dimension_numbers = #tpu.dot_dimension_numbers<[2], [1], [1], [2], [0, 0, 0, 1, 1, 2], [0], [0]>} : vector<8x8x8xf32>, vector<8x8x32xf32>, vector<8x8x32xf32> -> vector<8x8x32xf32>
    "tpu.trace_stop"() : () -> ()
    %83 = vector.shape_cast %82 : vector<8x8x32xf32> to vector<4x2x8x32xf32>
    %cst_45 = arith.constant dense<0.000000e+00> : vector<2x8x32xf32>
    %84 = vector.multi_reduction <add>, %83, %cst_45 [0] : vector<4x2x8x32xf32> to vector<2x8x32xf32>
    %85 = vector.shape_cast %84 : vector<2x8x32xf32> to vector<16x32xf32>
    %c0_46 = arith.constant 0 : index
    %c0_47 = arith.constant 0 : index
    %c0_48 = arith.constant 0 : index
    %86 = vector.load %arg9[%c0_46, %c0_47, %c0_48] : memref<2x32x32xf32, #tpu.memory_space<vmem>>, vector<1x32x32xf32>
    %87 = vector.shape_cast %86 : vector<1x32x32xf32> to vector<32x32xf32>
    %cst_49 = arith.constant dense<0.000000e+00> : vector<16x32xf32>
    %88 = tpu.matmul %85, %87, %cst_49 {dimension_numbers = #tpu.dot_dimension_numbers<[1], [0], [0], [1], [0, 0, 1, 1], [], []>} : vector<16x32xf32>, vector<32x32xf32>, vector<16x32xf32> -> vector<16x32xf32>
    %c0_50 = arith.constant 0 : index
    %c0_51 = arith.constant 0 : index
    %c0_52 = arith.constant 0 : index
    %89 = vector.load %arg10[%c0_50, %c0_51, %c0_52] : memref<2x1x32xf32, #tpu.memory_space<vmem>>, vector<1x1x32xf32>
    %90 = vector.shape_cast %89 : vector<1x1x32xf32> to vector<1x32xf32>
    %91 = vector.broadcast %90 : vector<1x32xf32> to vector<16x32xf32>
    %92 = arith.addf %88, %91 : vector<16x32xf32>
    %93 = arith.addf %16, %92 : vector<16x32xf32>
    %c0_53 = arith.constant 0 : index
    %c0_54 = arith.constant 0 : index
    %c0_55 = arith.constant 0 : index
    %c0_56 = arith.constant 0 : index
    %94 = vector.load %arg11[%c0_53, %c0_54, %c0_55, %c0_56] : memref<2x4x1x32xf32, #tpu.memory_space<vmem>>, vector<1x1x1x32xf32>
    %95 = vector.shape_cast %94 : vector<1x1x1x32xf32> to vector<1x32xf32>
    %c0_57 = arith.constant 0 : index
    %c1_58 = arith.constant 1 : index
    %c0_59 = arith.constant 0 : index
    %c0_60 = arith.constant 0 : index
    %96 = vector.load %arg11[%c0_57, %c1_58, %c0_59, %c0_60] : memref<2x4x1x32xf32, #tpu.memory_space<vmem>>, vector<1x1x1x32xf32>
    %97 = vector.shape_cast %96 : vector<1x1x1x32xf32> to vector<1x32xf32>
    %cst_61 = arith.constant dense<0.000000e+00> : vector<16xf32>
    %98 = vector.multi_reduction <add>, %93, %cst_61 [1] : vector<16x32xf32> to vector<16xf32>
    %99 = vector.shape_cast %98 : vector<16xf32> to vector<16x1xf32>
    %cst_62 = arith.constant 3.200000e+01 : f32
    %100 = vector.broadcast %cst_62 : f32 to vector<16x1xf32>
    %101 = arith.divf %99, %100 : vector<16x1xf32>
    %102 = vector.broadcast %101 : vector<16x1xf32> to vector<16x32xf32>
    %103 = arith.subf %93, %102 : vector<16x32xf32>
    %104 = arith.mulf %103, %103 : vector<16x32xf32>
    %cst_63 = arith.constant dense<0.000000e+00> : vector<16xf32>
    %105 = vector.multi_reduction <add>, %104, %cst_63 [1] : vector<16x32xf32> to vector<16xf32>
    %106 = vector.shape_cast %105 : vector<16xf32> to vector<16x1xf32>
    %cst_64 = arith.constant 3.200000e+01 : f32
    %107 = vector.broadcast %cst_64 : f32 to vector<16x1xf32>
    %108 = arith.divf %106, %107 : vector<16x1xf32>
    %cst_65 = arith.constant 9.99999974E-6 : f32
    %109 = vector.broadcast %cst_65 : f32 to vector<16x1xf32>
    %110 = arith.addf %108, %109 : vector<16x1xf32>
    %111 = math.rsqrt %110 : vector<16x1xf32>
    %112 = vector.broadcast %111 : vector<16x1xf32> to vector<16x32xf32>
    %113 = arith.mulf %103, %112 : vector<16x32xf32>
    %114 = vector.broadcast %95 : vector<1x32xf32> to vector<16x32xf32>
    %115 = arith.mulf %113, %114 : vector<16x32xf32>
    %116 = vector.broadcast %97 : vector<1x32xf32> to vector<16x32xf32>
    %117 = arith.addf %115, %116 : vector<16x32xf32>
    %c0_66 = arith.constant 0 : index
    %c0_67 = arith.constant 0 : index
    %c0_68 = arith.constant 0 : index
    %118 = vector.load %arg12[%c0_66, %c0_67, %c0_68] : memref<2x32x64xf32, #tpu.memory_space<vmem>>, vector<1x32x64xf32>
    %119 = vector.shape_cast %118 : vector<1x32x64xf32> to vector<32x64xf32>
    %cst_69 = arith.constant dense<0.000000e+00> : vector<16x64xf32>
    %120 = tpu.matmul %117, %119, %cst_69 {dimension_numbers = #tpu.dot_dimension_numbers<[1], [0], [0], [1], [0, 0, 1, 1], [], []>} : vector<16x32xf32>, vector<32x64xf32>, vector<16x64xf32> -> vector<16x64xf32>
    %c0_70 = arith.constant 0 : index
    %c0_71 = arith.constant 0 : index
    %c0_72 = arith.constant 0 : index
    %121 = vector.load %arg13[%c0_70, %c0_71, %c0_72] : memref<2x1x64xf32, #tpu.memory_space<vmem>>, vector<1x1x64xf32>
    %122 = vector.shape_cast %121 : vector<1x1x64xf32> to vector<1x64xf32>
    %123 = vector.broadcast %122 : vector<1x64xf32> to vector<16x64xf32>
    %124 = arith.addf %120, %123 : vector<16x64xf32>
    %cst_73 = arith.constant 0.000000e+00 : f32
    %125 = vector.broadcast %cst_73 : f32 to vector<16x64xf32>
    %126 = arith.maximumf %124, %125 : vector<16x64xf32>
    %c0_74 = arith.constant 0 : index
    %c0_75 = arith.constant 0 : index
    %c0_76 = arith.constant 0 : index
    %127 = vector.load %arg14[%c0_74, %c0_75, %c0_76] : memref<2x64x32xf32, #tpu.memory_space<vmem>>, vector<1x64x32xf32>
    %128 = vector.shape_cast %127 : vector<1x64x32xf32> to vector<64x32xf32>
    %cst_77 = arith.constant dense<0.000000e+00> : vector<16x32xf32>
    %129 = tpu.matmul %126, %128, %cst_77 {dimension_numbers = #tpu.dot_dimension_numbers<[1], [0], [0], [1], [0, 0, 1, 1], [], []>} : vector<16x64xf32>, vector<64x32xf32>, vector<16x32xf32> -> vector<16x32xf32>
    %c0_78 = arith.constant 0 : index
    %c0_79 = arith.constant 0 : index
    %c0_80 = arith.constant 0 : index
    %130 = vector.load %arg15[%c0_78, %c0_79, %c0_80] : memref<2x1x32xf32, #tpu.memory_space<vmem>>, vector<1x1x32xf32>
    %131 = vector.shape_cast %130 : vector<1x1x32xf32> to vector<1x32xf32>
    %132 = vector.broadcast %131 : vector<1x32xf32> to vector<16x32xf32>
    %133 = arith.addf %129, %132 : vector<16x32xf32>
    %134 = arith.addf %117, %133 : vector<16x32xf32>
    %c0_81 = arith.constant 0 : index
    %c2_82 = arith.constant 2 : index
    %c0_83 = arith.constant 0 : index
    %c0_84 = arith.constant 0 : index
    %135 = vector.load %arg11[%c0_81, %c2_82, %c0_83, %c0_84] : memref<2x4x1x32xf32, #tpu.memory_space<vmem>>, vector<1x1x1x32xf32>
    %136 = vector.shape_cast %135 : vector<1x1x1x32xf32> to vector<1x32xf32>
    %c0_85 = arith.constant 0 : index
    %c3 = arith.constant 3 : index
    %c0_86 = arith.constant 0 : index
    %c0_87 = arith.constant 0 : index
    %137 = vector.load %arg11[%c0_85, %c3, %c0_86, %c0_87] : memref<2x4x1x32xf32, #tpu.memory_space<vmem>>, vector<1x1x1x32xf32>
    %138 = vector.shape_cast %137 : vector<1x1x1x32xf32> to vector<1x32xf32>
    %cst_88 = arith.constant dense<0.000000e+00> : vector<16xf32>
    %139 = vector.multi_reduction <add>, %134, %cst_88 [1] : vector<16x32xf32> to vector<16xf32>
    %140 = vector.shape_cast %139 : vector<16xf32> to vector<16x1xf32>
    %cst_89 = arith.constant 3.200000e+01 : f32
    %141 = vector.broadcast %cst_89 : f32 to vector<16x1xf32>
    %142 = arith.divf %140, %141 : vector<16x1xf32>
    %143 = vector.broadcast %142 : vector<16x1xf32> to vector<16x32xf32>
    %144 = arith.subf %134, %143 : vector<16x32xf32>
    %145 = arith.mulf %144, %144 : vector<16x32xf32>
    %cst_90 = arith.constant dense<0.000000e+00> : vector<16xf32>
    %146 = vector.multi_reduction <add>, %145, %cst_90 [1] : vector<16x32xf32> to vector<16xf32>
    %147 = vector.shape_cast %146 : vector<16xf32> to vector<16x1xf32>
    %cst_91 = arith.constant 3.200000e+01 : f32
    %148 = vector.broadcast %cst_91 : f32 to vector<16x1xf32>
    %149 = arith.divf %147, %148 : vector<16x1xf32>
    %cst_92 = arith.constant 9.99999974E-6 : f32
    %150 = vector.broadcast %cst_92 : f32 to vector<16x1xf32>
    %151 = arith.addf %149, %150 : vector<16x1xf32>
    %152 = math.rsqrt %151 : vector<16x1xf32>
    %153 = vector.broadcast %152 : vector<16x1xf32> to vector<16x32xf32>
    %154 = arith.mulf %144, %153 : vector<16x32xf32>
    %155 = vector.broadcast %136 : vector<1x32xf32> to vector<16x32xf32>
    %156 = arith.mulf %154, %155 : vector<16x32xf32>
    %157 = vector.broadcast %138 : vector<1x32xf32> to vector<16x32xf32>
    %158 = arith.addf %156, %157 : vector<16x32xf32>
    %c1_93 = arith.constant 1 : index
    %c0_94 = arith.constant 0 : index
    %c0_95 = arith.constant 0 : index
    %c0_96 = arith.constant 0 : index
    %159 = vector.load %arg7[%c1_93, %c0_94, %c0_95, %c0_96] : memref<2x3x32x32xf32, #tpu.memory_space<vmem>>, vector<1x1x32x32xf32>
    %160 = vector.shape_cast %159 : vector<1x1x32x32xf32> to vector<32x32xf32>
    %cst_97 = arith.constant dense<0.000000e+00> : vector<16x32xf32>
    %161 = tpu.matmul %158, %160, %cst_97 {dimension_numbers = #tpu.dot_dimension_numbers<[1], [0], [0], [1], [0, 0, 1, 1], [], []>} : vector<16x32xf32>, vector<32x32xf32>, vector<16x32xf32> -> vector<16x32xf32>
    %c1_98 = arith.constant 1 : index
    %c0_99 = arith.constant 0 : index
    %c0_100 = arith.constant 0 : index
    %c0_101 = arith.constant 0 : index
    %162 = vector.load %arg8[%c1_98, %c0_99, %c0_100, %c0_101] : memref<2x3x1x32xf32, #tpu.memory_space<vmem>>, vector<1x1x1x32xf32>
    %163 = vector.shape_cast %162 : vector<1x1x1x32xf32> to vector<1x32xf32>
    %164 = vector.broadcast %163 : vector<1x32xf32> to vector<16x32xf32>
    %165 = arith.addf %161, %164 : vector<16x32xf32>
    %166 = vector.shape_cast %165 : vector<16x32xf32> to vector<2x8x32xf32>
    %c1_102 = arith.constant 1 : index
    %c1_103 = arith.constant 1 : index
    %c0_104 = arith.constant 0 : index
    %c0_105 = arith.constant 0 : index
    %167 = vector.load %arg7[%c1_102, %c1_103, %c0_104, %c0_105] : memref<2x3x32x32xf32, #tpu.memory_space<vmem>>, vector<1x1x32x32xf32>
    %168 = vector.shape_cast %167 : vector<1x1x32x32xf32> to vector<32x32xf32>
    %cst_106 = arith.constant dense<0.000000e+00> : vector<16x32xf32>
    %169 = tpu.matmul %158, %168, %cst_106 {dimension_numbers = #tpu.dot_dimension_numbers<[1], [0], [0], [1], [0, 0, 1, 1], [], []>} : vector<16x32xf32>, vector<32x32xf32>, vector<16x32xf32> -> vector<16x32xf32>
    %c1_107 = arith.constant 1 : index
    %c1_108 = arith.constant 1 : index
    %c0_109 = arith.constant 0 : index
    %c0_110 = arith.constant 0 : index
    %170 = vector.load %arg8[%c1_107, %c1_108, %c0_109, %c0_110] : memref<2x3x1x32xf32, #tpu.memory_space<vmem>>, vector<1x1x1x32xf32>
    %171 = vector.shape_cast %170 : vector<1x1x1x32xf32> to vector<1x32xf32>
    %172 = vector.broadcast %171 : vector<1x32xf32> to vector<16x32xf32>
    %173 = arith.addf %169, %172 : vector<16x32xf32>
    %174 = vector.shape_cast %173 : vector<16x32xf32> to vector<2x8x32xf32>
    %c1_111 = arith.constant 1 : index
    %c2_112 = arith.constant 2 : index
    %c0_113 = arith.constant 0 : index
    %c0_114 = arith.constant 0 : index
    %175 = vector.load %arg7[%c1_111, %c2_112, %c0_113, %c0_114] : memref<2x3x32x32xf32, #tpu.memory_space<vmem>>, vector<1x1x32x32xf32>
    %176 = vector.shape_cast %175 : vector<1x1x32x32xf32> to vector<32x32xf32>
    %cst_115 = arith.constant dense<0.000000e+00> : vector<16x32xf32>
    %177 = tpu.matmul %158, %176, %cst_115 {dimension_numbers = #tpu.dot_dimension_numbers<[1], [0], [0], [1], [0, 0, 1, 1], [], []>} : vector<16x32xf32>, vector<32x32xf32>, vector<16x32xf32> -> vector<16x32xf32>
    %c1_116 = arith.constant 1 : index
    %c2_117 = arith.constant 2 : index
    %c0_118 = arith.constant 0 : index
    %c0_119 = arith.constant 0 : index
    %178 = vector.load %arg8[%c1_116, %c2_117, %c0_118, %c0_119] : memref<2x3x1x32xf32, #tpu.memory_space<vmem>>, vector<1x1x1x32xf32>
    %179 = vector.shape_cast %178 : vector<1x1x1x32xf32> to vector<1x32xf32>
    %180 = vector.broadcast %179 : vector<1x32xf32> to vector<16x32xf32>
    %181 = arith.addf %177, %180 : vector<16x32xf32>
    %182 = vector.shape_cast %181 : vector<16x32xf32> to vector<2x8x32xf32>
    %183 = vector.shape_cast %166 : vector<2x8x32xf32> to vector<1x2x8x32xf32>
    %184 = vector.broadcast %183 : vector<1x2x8x32xf32> to vector<4x2x8x32xf32>
    %185 = vector.broadcast %30 : vector<4x1x1x32xf32> to vector<4x2x8x32xf32>
    %186 = arith.mulf %184, %185 : vector<4x2x8x32xf32>
    %187 = vector.shape_cast %186 : vector<4x2x8x32xf32> to vector<8x8x32xf32>
    %188 = vector.shape_cast %182 : vector<2x8x32xf32> to vector<1x2x8x32xf32>
    %189 = vector.broadcast %188 : vector<1x2x8x32xf32> to vector<4x2x8x32xf32>
    %190 = vector.broadcast %30 : vector<4x1x1x32xf32> to vector<4x2x8x32xf32>
    %191 = arith.mulf %189, %190 : vector<4x2x8x32xf32>
    %192 = vector.shape_cast %191 : vector<4x2x8x32xf32> to vector<8x8x32xf32>
    %193 = vector.shape_cast %174 : vector<2x8x32xf32> to vector<1x2x8x32xf32>
    %194 = vector.shape_cast %193 : vector<1x2x8x32xf32> to vector<1x2x8x32xf32>
    %195 = vector.broadcast %194 : vector<1x2x8x32xf32> to vector<4x2x8x32xf32>
    %196 = vector.shape_cast %195 : vector<4x2x8x32xf32> to vector<8x8x32xf32>
    "tpu.trace_start"() <{level = 10 : i32, message = "gqd,gkd->gqk"}> : () -> ()
    %cst_120 = arith.constant dense<0.000000e+00> : vector<8x8x8xf32>
    %197 = tpu.matmul %187, %196, %cst_120 {dimension_numbers = #tpu.dot_dimension_numbers<[2], [2], [1], [1], [0, 0, 0, 1, 1, 1], [0], [0]>} : vector<8x8x32xf32>, vector<8x8x32xf32>, vector<8x8x8xf32> -> vector<8x8x8xf32>
    "tpu.trace_stop"() : () -> ()
    %cst_121 = arith.constant 0.353553385 : f32
    %198 = vector.broadcast %cst_121 : f32 to vector<8x8x8xf32>
    %199 = arith.mulf %197, %198 : vector<8x8x8xf32>
    %cst_122 = arith.constant dense<0xFF800000> : vector<8x8xf32>
    %200 = vector.multi_reduction <maximumf>, %199, %cst_122 [2] : vector<8x8x8xf32> to vector<8x8xf32>
    %201 = vector.shape_cast %200 : vector<8x8xf32> to vector<8x8x1xf32>
    %202 = vector.broadcast %201 : vector<8x8x1xf32> to vector<8x8x8xf32>
    %203 = arith.subf %199, %202 : vector<8x8x8xf32>
    %204 = math.exp %203 : vector<8x8x8xf32>
    %cst_123 = arith.constant dense<0.000000e+00> : vector<8x8xf32>
    %205 = vector.multi_reduction <add>, %204, %cst_123 [2] : vector<8x8x8xf32> to vector<8x8xf32>
    %206 = vector.shape_cast %205 : vector<8x8xf32> to vector<8x8x1xf32>
    %207 = tpu.reciprocal %206 {approx = true} : vector<8x8x1xf32> -> vector<8x8x1xf32>
    %208 = vector.broadcast %207 : vector<8x8x1xf32> to vector<8x8x8xf32>
    %209 = arith.mulf %204, %208 : vector<8x8x8xf32>
    "tpu.trace_start"() <{level = 10 : i32, message = "gqk,gkd->gqd"}> : () -> ()
    %cst_124 = arith.constant dense<0.000000e+00> : vector<8x8x32xf32>
    %210 = tpu.matmul %209, %192, %cst_124 {dimension_numbers = #tpu.dot_dimension_numbers<[2], [1], [1], [2], [0, 0, 0, 1, 1, 2], [0], [0]>} : vector<8x8x8xf32>, vector<8x8x32xf32>, vector<8x8x32xf32> -> vector<8x8x32xf32>
    "tpu.trace_stop"() : () -> ()
    %211 = vector.shape_cast %210 : vector<8x8x32xf32> to vector<4x2x8x32xf32>
    %cst_125 = arith.constant dense<0.000000e+00> : vector<2x8x32xf32>
    %212 = vector.multi_reduction <add>, %211, %cst_125 [0] : vector<4x2x8x32xf32> to vector<2x8x32xf32>
    %213 = vector.shape_cast %212 : vector<2x8x32xf32> to vector<16x32xf32>
    %c1_126 = arith.constant 1 : index
    %c0_127 = arith.constant 0 : index
    %c0_128 = arith.constant 0 : index
    %214 = vector.load %arg9[%c1_126, %c0_127, %c0_128] : memref<2x32x32xf32, #tpu.memory_space<vmem>>, vector<1x32x32xf32>
    %215 = vector.shape_cast %214 : vector<1x32x32xf32> to vector<32x32xf32>
    %cst_129 = arith.constant dense<0.000000e+00> : vector<16x32xf32>
    %216 = tpu.matmul %213, %215, %cst_129 {dimension_numbers = #tpu.dot_dimension_numbers<[1], [0], [0], [1], [0, 0, 1, 1], [], []>} : vector<16x32xf32>, vector<32x32xf32>, vector<16x32xf32> -> vector<16x32xf32>
    %c1_130 = arith.constant 1 : index
    %c0_131 = arith.constant 0 : index
    %c0_132 = arith.constant 0 : index
    %217 = vector.load %arg10[%c1_130, %c0_131, %c0_132] : memref<2x1x32xf32, #tpu.memory_space<vmem>>, vector<1x1x32xf32>
    %218 = vector.shape_cast %217 : vector<1x1x32xf32> to vector<1x32xf32>
    %219 = vector.broadcast %218 : vector<1x32xf32> to vector<16x32xf32>
    %220 = arith.addf %216, %219 : vector<16x32xf32>
    %221 = arith.addf %158, %220 : vector<16x32xf32>
    %c1_133 = arith.constant 1 : index
    %c0_134 = arith.constant 0 : index
    %c0_135 = arith.constant 0 : index
    %c0_136 = arith.constant 0 : index
    %222 = vector.load %arg11[%c1_133, %c0_134, %c0_135, %c0_136] : memref<2x4x1x32xf32, #tpu.memory_space<vmem>>, vector<1x1x1x32xf32>
    %223 = vector.shape_cast %222 : vector<1x1x1x32xf32> to vector<1x32xf32>
    %c1_137 = arith.constant 1 : index
    %c1_138 = arith.constant 1 : index
    %c0_139 = arith.constant 0 : index
    %c0_140 = arith.constant 0 : index
    %224 = vector.load %arg11[%c1_137, %c1_138, %c0_139, %c0_140] : memref<2x4x1x32xf32, #tpu.memory_space<vmem>>, vector<1x1x1x32xf32>
    %225 = vector.shape_cast %224 : vector<1x1x1x32xf32> to vector<1x32xf32>
    %cst_141 = arith.constant dense<0.000000e+00> : vector<16xf32>
    %226 = vector.multi_reduction <add>, %221, %cst_141 [1] : vector<16x32xf32> to vector<16xf32>
    %227 = vector.shape_cast %226 : vector<16xf32> to vector<16x1xf32>
    %cst_142 = arith.constant 3.200000e+01 : f32
    %228 = vector.broadcast %cst_142 : f32 to vector<16x1xf32>
    %229 = arith.divf %227, %228 : vector<16x1xf32>
    %230 = vector.broadcast %229 : vector<16x1xf32> to vector<16x32xf32>
    %231 = arith.subf %221, %230 : vector<16x32xf32>
    %232 = arith.mulf %231, %231 : vector<16x32xf32>
    %cst_143 = arith.constant dense<0.000000e+00> : vector<16xf32>
    %233 = vector.multi_reduction <add>, %232, %cst_143 [1] : vector<16x32xf32> to vector<16xf32>
    %234 = vector.shape_cast %233 : vector<16xf32> to vector<16x1xf32>
    %cst_144 = arith.constant 3.200000e+01 : f32
    %235 = vector.broadcast %cst_144 : f32 to vector<16x1xf32>
    %236 = arith.divf %234, %235 : vector<16x1xf32>
    %cst_145 = arith.constant 9.99999974E-6 : f32
    %237 = vector.broadcast %cst_145 : f32 to vector<16x1xf32>
    %238 = arith.addf %236, %237 : vector<16x1xf32>
    %239 = math.rsqrt %238 : vector<16x1xf32>
    %240 = vector.broadcast %239 : vector<16x1xf32> to vector<16x32xf32>
    %241 = arith.mulf %231, %240 : vector<16x32xf32>
    %242 = vector.broadcast %223 : vector<1x32xf32> to vector<16x32xf32>
    %243 = arith.mulf %241, %242 : vector<16x32xf32>
    %244 = vector.broadcast %225 : vector<1x32xf32> to vector<16x32xf32>
    %245 = arith.addf %243, %244 : vector<16x32xf32>
    %c1_146 = arith.constant 1 : index
    %c0_147 = arith.constant 0 : index
    %c0_148 = arith.constant 0 : index
    %246 = vector.load %arg12[%c1_146, %c0_147, %c0_148] : memref<2x32x64xf32, #tpu.memory_space<vmem>>, vector<1x32x64xf32>
    %247 = vector.shape_cast %246 : vector<1x32x64xf32> to vector<32x64xf32>
    %cst_149 = arith.constant dense<0.000000e+00> : vector<16x64xf32>
    %248 = tpu.matmul %245, %247, %cst_149 {dimension_numbers = #tpu.dot_dimension_numbers<[1], [0], [0], [1], [0, 0, 1, 1], [], []>} : vector<16x32xf32>, vector<32x64xf32>, vector<16x64xf32> -> vector<16x64xf32>
    %c1_150 = arith.constant 1 : index
    %c0_151 = arith.constant 0 : index
    %c0_152 = arith.constant 0 : index
    %249 = vector.load %arg13[%c1_150, %c0_151, %c0_152] : memref<2x1x64xf32, #tpu.memory_space<vmem>>, vector<1x1x64xf32>
    %250 = vector.shape_cast %249 : vector<1x1x64xf32> to vector<1x64xf32>
    %251 = vector.broadcast %250 : vector<1x64xf32> to vector<16x64xf32>
    %252 = arith.addf %248, %251 : vector<16x64xf32>
    %cst_153 = arith.constant 0.000000e+00 : f32
    %253 = vector.broadcast %cst_153 : f32 to vector<16x64xf32>
    %254 = arith.maximumf %252, %253 : vector<16x64xf32>
    %c1_154 = arith.constant 1 : index
    %c0_155 = arith.constant 0 : index
    %c0_156 = arith.constant 0 : index
    %255 = vector.load %arg14[%c1_154, %c0_155, %c0_156] : memref<2x64x32xf32, #tpu.memory_space<vmem>>, vector<1x64x32xf32>
    %256 = vector.shape_cast %255 : vector<1x64x32xf32> to vector<64x32xf32>
    %cst_157 = arith.constant dense<0.000000e+00> : vector<16x32xf32>
    %257 = tpu.matmul %254, %256, %cst_157 {dimension_numbers = #tpu.dot_dimension_numbers<[1], [0], [0], [1], [0, 0, 1, 1], [], []>} : vector<16x64xf32>, vector<64x32xf32>, vector<16x32xf32> -> vector<16x32xf32>
    %c1_158 = arith.constant 1 : index
    %c0_159 = arith.constant 0 : index
    %c0_160 = arith.constant 0 : index
    %258 = vector.load %arg15[%c1_158, %c0_159, %c0_160] : memref<2x1x32xf32, #tpu.memory_space<vmem>>, vector<1x1x32xf32>
    %259 = vector.shape_cast %258 : vector<1x1x32xf32> to vector<1x32xf32>
    %260 = vector.broadcast %259 : vector<1x32xf32> to vector<16x32xf32>
    %261 = arith.addf %257, %260 : vector<16x32xf32>
    %262 = arith.addf %245, %261 : vector<16x32xf32>
    %c1_161 = arith.constant 1 : index
    %c2_162 = arith.constant 2 : index
    %c0_163 = arith.constant 0 : index
    %c0_164 = arith.constant 0 : index
    %263 = vector.load %arg11[%c1_161, %c2_162, %c0_163, %c0_164] : memref<2x4x1x32xf32, #tpu.memory_space<vmem>>, vector<1x1x1x32xf32>
    %264 = vector.shape_cast %263 : vector<1x1x1x32xf32> to vector<1x32xf32>
    %c1_165 = arith.constant 1 : index
    %c3_166 = arith.constant 3 : index
    %c0_167 = arith.constant 0 : index
    %c0_168 = arith.constant 0 : index
    %265 = vector.load %arg11[%c1_165, %c3_166, %c0_167, %c0_168] : memref<2x4x1x32xf32, #tpu.memory_space<vmem>>, vector<1x1x1x32xf32>
    %266 = vector.shape_cast %265 : vector<1x1x1x32xf32> to vector<1x32xf32>
    %cst_169 = arith.constant dense<0.000000e+00> : vector<16xf32>
    %267 = vector.multi_reduction <add>, %262, %cst_169 [1] : vector<16x32xf32> to vector<16xf32>
    %268 = vector.shape_cast %267 : vector<16xf32> to vector<16x1xf32>
    %cst_170 = arith.constant 3.200000e+01 : f32
    %269 = vector.broadcast %cst_170 : f32 to vector<16x1xf32>
    %270 = arith.divf %268, %269 : vector<16x1xf32>
    %271 = vector.broadcast %270 : vector<16x1xf32> to vector<16x32xf32>
    %272 = arith.subf %262, %271 : vector<16x32xf32>
    %273 = arith.mulf %272, %272 : vector<16x32xf32>
    %cst_171 = arith.constant dense<0.000000e+00> : vector<16xf32>
    %274 = vector.multi_reduction <add>, %273, %cst_171 [1] : vector<16x32xf32> to vector<16xf32>
    %275 = vector.shape_cast %274 : vector<16xf32> to vector<16x1xf32>
    %cst_172 = arith.constant 3.200000e+01 : f32
    %276 = vector.broadcast %cst_172 : f32 to vector<16x1xf32>
    %277 = arith.divf %275, %276 : vector<16x1xf32>
    %cst_173 = arith.constant 9.99999974E-6 : f32
    %278 = vector.broadcast %cst_173 : f32 to vector<16x1xf32>
    %279 = arith.addf %277, %278 : vector<16x1xf32>
    %280 = math.rsqrt %279 : vector<16x1xf32>
    %281 = vector.broadcast %280 : vector<16x1xf32> to vector<16x32xf32>
    %282 = arith.mulf %272, %281 : vector<16x32xf32>
    %283 = vector.broadcast %264 : vector<1x32xf32> to vector<16x32xf32>
    %284 = arith.mulf %282, %283 : vector<16x32xf32>
    %285 = vector.broadcast %266 : vector<1x32xf32> to vector<16x32xf32>
    %286 = arith.addf %284, %285 : vector<16x32xf32>
    %287 = tpu.iota {dimensions = array<i32: 0>} : vector<2x16xi32>
    %288 = tpu.iota {dimensions = array<i32: 1>} : vector<2x16xi32>
    %c8_i32_174 = arith.constant 8 : i32
    %289 = vector.broadcast %c8_i32_174 : i32 to vector<2x16xi32>
    %290 = arith.muli %287, %289 : vector<2x16xi32>
    %291 = arith.cmpi sge, %288, %290 : vector<2x16xi32>
    %c1_i32_175 = arith.constant 1 : i32
    %292 = vector.broadcast %c1_i32_175 : i32 to vector<2x16xi32>
    %293 = arith.addi %287, %292 : vector<2x16xi32>
    %c8_i32_176 = arith.constant 8 : i32
    %294 = vector.broadcast %c8_i32_176 : i32 to vector<2x16xi32>
    %295 = arith.muli %293, %294 : vector<2x16xi32>
    %296 = arith.cmpi slt, %288, %295 : vector<2x16xi32>
    %297 = arith.andi %291, %296 : vector<2x16xi1>
    %cst_177 = arith.constant 1.250000e-01 : f32
    %cst_178 = arith.constant 0.000000e+00 : f32
    %298 = vector.broadcast %cst_177 : f32 to vector<2x16xf32>
    %299 = vector.broadcast %cst_178 : f32 to vector<2x16xf32>
    %300 = arith.select %297, %298, %299 : vector<2x16xi1>, vector<2x16xf32>
    %cst_179 = arith.constant dense<0.000000e+00> : vector<2x32xf32>
    %301 = tpu.matmul %300, %286, %cst_179 {dimension_numbers = #tpu.dot_dimension_numbers<[1], [0], [0], [1], [0, 0, 1, 1], [], []>} : vector<2x16xf32>, vector<16x32xf32>, vector<2x32xf32> -> vector<2x32xf32>
    %c0_180 = arith.constant 0 : index
    %c0_181 = arith.constant 0 : index
    %302 = vector.load %arg16[%c0_180, %c0_181] : memref<32x128xf32, #tpu.memory_space<vmem>>, vector<32x128xf32>
    %cst_182 = arith.constant dense<0.000000e+00> : vector<2x128xf32>
    %303 = tpu.matmul %301, %302, %cst_182 {dimension_numbers = #tpu.dot_dimension_numbers<[1], [0], [0], [1], [0, 0, 1, 1], [], []>} : vector<2x32xf32>, vector<32x128xf32>, vector<2x128xf32> -> vector<2x128xf32>
    %c0_183 = arith.constant 0 : index
    %c0_184 = arith.constant 0 : index
    %304 = vector.load %arg17[%c0_183, %c0_184] : memref<1x128xf32, #tpu.memory_space<vmem>>, vector<1x128xf32>
    %305 = vector.broadcast %304 : vector<1x128xf32> to vector<2x128xf32>
    %306 = arith.addf %303, %305 : vector<2x128xf32>
    %c0_185 = arith.constant 0 : index
    %c0_186 = arith.constant 0 : index
    %307 = vector.load %arg18[%c0_185, %c0_186] : memref<2x128xf32, #tpu.memory_space<vmem>>, vector<2x128xf32>
    tpu.vector_store %arg18[%c0_185, %c0_186], %306 {strides = array<i32>} : memref<2x128xf32, #tpu.memory_space<vmem>>, vector<2x128xf32>,
    return
  }
  func.func @transform_0(%arg0: i32) -> (i32, i32) {
    %c0_i32 = arith.constant 0 : i32
    %c0_i32_0 = arith.constant 0 : i32
    %c0_i32_1 = arith.constant 0 : i32
    return %c0_i32, %c0_i32_0 : i32, i32
  }
  func.func @transform_1(%arg0: i32) -> (i32, i32) {
    %c0_i32 = arith.constant 0 : i32
    %c0_i32_0 = arith.constant 0 : i32
    %c0_i32_1 = arith.constant 0 : i32
    return %c0_i32, %c0_i32_0 : i32, i32
  }
  func.func @transform_2(%arg0: i32) -> (i32, i32) {
    %c0_i32 = arith.constant 0 : i32
    %c0_i32_0 = arith.constant 0 : i32
    %c0_i32_1 = arith.constant 0 : i32
    return %c0_i32, %c0_i32_0 : i32, i32
  }
  func.func @transform_3(%arg0: i32) -> (i32, i32) {
    %c0_i32 = arith.constant 0 : i32
    %c0_i32_0 = arith.constant 0 : i32
    %c0_i32_1 = arith.constant 0 : i32
    return %c0_i32, %c0_i32_0 : i32, i32
  }
  func.func @transform_4(%arg0: i32) -> (i32, i32) {
    %c0_i32 = arith.constant 0 : i32
    %c0_i32_0 = arith.constant 0 : i32
    %c0_i32_1 = arith.constant 0 : i32
    return %c0_i32, %c0_i32_0 : i32, i32
  }
  func.func @transform_5(%arg0: i32) -> (i32, i32) {
    %c0_i32 = arith.constant 0 : i32
    %c0_i32_0 = arith.constant 0 : i32
    %c0_i32_1 = arith.constant 0 : i32
    return %c0_i32, %c0_i32_0 : i32, i32
  }
  func.func @transform_6(%arg0: i32) -> (i32, i32, i32, i32) {
    %c0_i32 = arith.constant 0 : i32
    %c0_i32_0 = arith.constant 0 : i32
    %c0_i32_1 = arith.constant 0 : i32
    %c0_i32_2 = arith.constant 0 : i32
    %c0_i32_3 = arith.constant 0 : i32
    return %c0_i32, %c0_i32_0, %c0_i32_1, %c0_i32_2 : i32, i32, i32, i32
  }
  func.func @transform_7(%arg0: i32) -> (i32, i32, i32, i32) {
    %c0_i32 = arith.constant 0 : i32
    %c0_i32_0 = arith.constant 0 : i32
    %c0_i32_1 = arith.constant 0 : i32
    %c0_i32_2 = arith.constant 0 : i32
    %c0_i32_3 = arith.constant 0 : i32
    return %c0_i32, %c0_i32_0, %c0_i32_1, %c0_i32_2 : i32, i32, i32, i32
  }
  func.func @transform_8(%arg0: i32) -> (i32, i32, i32) {
    %c0_i32 = arith.constant 0 : i32
    %c0_i32_0 = arith.constant 0 : i32
    %c0_i32_1 = arith.constant 0 : i32
    %c0_i32_2 = arith.constant 0 : i32
    return %c0_i32, %c0_i32_0, %c0_i32_1 : i32, i32, i32
  }
  func.func @transform_9(%arg0: i32) -> (i32, i32, i32) {
    %c0_i32 = arith.constant 0 : i32
    %c0_i32_0 = arith.constant 0 : i32
    %c0_i32_1 = arith.constant 0 : i32
    %c0_i32_2 = arith.constant 0 : i32
    return %c0_i32, %c0_i32_0, %c0_i32_1 : i32, i32, i32
  }
  func.func @transform_10(%arg0: i32) -> (i32, i32, i32, i32) {
    %c0_i32 = arith.constant 0 : i32
    %c0_i32_0 = arith.constant 0 : i32
    %c0_i32_1 = arith.constant 0 : i32
    %c0_i32_2 = arith.constant 0 : i32
    %c0_i32_3 = arith.constant 0 : i32
    return %c0_i32, %c0_i32_0, %c0_i32_1, %c0_i32_2 : i32, i32, i32, i32
  }
  func.func @transform_11(%arg0: i32) -> (i32, i32, i32) {
    %c0_i32 = arith.constant 0 : i32
    %c0_i32_0 = arith.constant 0 : i32
    %c0_i32_1 = arith.constant 0 : i32
    %c0_i32_2 = arith.constant 0 : i32
    return %c0_i32, %c0_i32_0, %c0_i32_1 : i32, i32, i32
  }
  func.func @transform_12(%arg0: i32) -> (i32, i32, i32) {
    %c0_i32 = arith.constant 0 : i32
    %c0_i32_0 = arith.constant 0 : i32
    %c0_i32_1 = arith.constant 0 : i32
    %c0_i32_2 = arith.constant 0 : i32
    return %c0_i32, %c0_i32_0, %c0_i32_1 : i32, i32, i32
  }
  func.func @transform_13(%arg0: i32) -> (i32, i32, i32) {
    %c0_i32 = arith.constant 0 : i32
    %c0_i32_0 = arith.constant 0 : i32
    %c0_i32_1 = arith.constant 0 : i32
    %c0_i32_2 = arith.constant 0 : i32
    return %c0_i32, %c0_i32_0, %c0_i32_1 : i32, i32, i32
  }
  func.func @transform_14(%arg0: i32) -> (i32, i32, i32) {
    %c0_i32 = arith.constant 0 : i32
    %c0_i32_0 = arith.constant 0 : i32
    %c0_i32_1 = arith.constant 0 : i32
    %c0_i32_2 = arith.constant 0 : i32
    return %c0_i32, %c0_i32_0, %c0_i32_1 : i32, i32, i32
  }
  func.func @transform_15(%arg0: i32) -> (i32, i32) {
    %c0_i32 = arith.constant 0 : i32
    %c0_i32_0 = arith.constant 0 : i32
    %c0_i32_1 = arith.constant 0 : i32
    return %c0_i32, %c0_i32_0 : i32, i32
  }
  func.func @transform_16(%arg0: i32) -> (i32, i32) {
    %c0_i32 = arith.constant 0 : i32
    %c0_i32_0 = arith.constant 0 : i32
    %c0_i32_1 = arith.constant 0 : i32
    return %c0_i32, %c0_i32_0 : i32, i32
  }
  func.func @transform_17(%arg0: i32) -> (i32, i32) {
    %c0_i32 = arith.constant 0 : i32
    %c0_i32_0 = arith.constant 0 : i32
    %c0_i32_1 = arith.constant 0 : i32
    return %c0_i32, %c0_i32_0 : i32, i32
  }
}

</mosaic_0001>

<bundles_post_ra>
// kernel: tpu_custom_call.1
= control target key start
LH: loop header
LB: loop body
LE: loop exit
PB: predicated region body
PF: predicated region fallthrough
CT: control target
= control target key end

     0   :  { %s6454_s0 = inlined_call_operand.hbm [shape: f32[16,16], index: 0, kind: input, shape index: {}]   ;;  %s6455_s1 = inlined_call_operand.hbm [shape: f32[16,32], index: 1, kind: input, shape index: {}]   ;;  %s6456_s2 = inlined_call_operand.hbm [shape: f32[16,32], index: 2, kind: input, shape index: {}]   ;;  %s6457_s3 = inlined_call_operand.hbm [shape: f32[1,32], index: 3, kind: input, shape index: {}]   ;;  %s6458_s4 = inlined_call_operand.hbm [shape: f32[32,32], index: 4, kind: input, shape index: {}]   ;;  %s6459_s5 = inlined_call_operand.hbm [shape: f32[1,32], index: 5, kind: input, shape index: {}]   ;;  %s6460_s6 = inlined_call_operand.vmem [shape: f32[2,3,32,32], index: 6, kind: input, shape index: {}]   ;;  %s6461_s7 = inlined_call_operand.hbm [shape: f32[2,3,1,32], index: 7, kind: input, shape index: {}]   ;;  %s6462_s8 = inlined_call_operand.hbm [shape: f32[2,32,32], index: 8, kind: input, shape index: {}]   ;;  %s6463_s9 = inlined_call_operand.vmem [shape: f32[2,1,32], index: 9, kind: input, shape index: {}]   ;;  %s6464_s10 = inlined_call_operand.hbm [shape: f32[2,4,1,32], index: 10, kind: input, shape index: {}]   ;;  %s6465_s11 = inlined_call_operand.hbm [shape: f32[2,32,64], index: 11, kind: input, shape index: {}]   ;;  %s6466_s12 = inlined_call_operand.vmem [shape: f32[2,1,64], index: 12, kind: input, shape index: {}]   ;;  %s6467_s13 = inlined_call_operand.vmem [shape: f32[2,64,32], index: 13, kind: input, shape index: {}]   ;;  %s6468_s14 = inlined_call_operand.vmem [shape: f32[2,1,32], index: 14, kind: input, shape index: {}]   ;;  %s6469_s15 = inlined_call_operand.vmem [shape: f32[32,128], index: 15, kind: input, shape index: {}]   ;;  %s6470_s16 = inlined_call_operand.vmem [shape: f32[1,128], index: 16, kind: input, shape index: {}]   ;;  %s6471_s17 = inlined_call_operand.hbm [shape: f32[2,128], index: 17, kind: output, shape index: {}]  }
   0x1   :  { %6476 = sst [smem:[#allocation27_spill]] %s6454_s0 }
   0x2   :  { %6477 = sst [smem:[#allocation28_spill]] %s6455_s1 }
   0x3   :  { %22 = vsyncpa [#allocation3], 0 }
   0x4   :  { %23 = vsyncpa [#allocation6], 0 }
   0x5   :  { %24 = vsyncpa [#allocation9], 0 }
   0x6   :  { %25 = vsyncpa [#allocation12], 0 }
   0x7   :  { %26 = vsyncpa [#allocation15], 0 }
   0x8   :  { %27 = vsyncpa [#allocation18], 0 }
   0x9   :  { %28 = vsyncpa [#allocation4], 0  ;;  %s5648_s24 = smov [#allocation5]   ;;  %s5649_s26 = smov [#allocation8]  }
   0xa   :  { %s46_s25 = sshll.u32 %s5648_s24, 4  ;;  %s71_s27 = sshll.u32 %s5649_s26, 4  ;;  %s47_s25 = int_to_ptr.vmem [resolvable:$true] %s46_s25  ;;  %s5757_s27 = int_to_ptr.vmem [resolvable:$true] %s71_s27 }
   0xb   :  { %s6478_s0 = sld [smem:[#allocation28_spill]] }
  0x11   :  { %s5392_s30 = scalar_lea.hbm %s6478_s0, 256 }
  0x12   :  { %p5393_p0 = scmp.ne.s32.totalorder %s6478_s0, %s5392_s30  ;;  %p5396_p1 = scmp.lt.u32.totalorder %s5392_s30, %s6478_s0 }
  0x14   :  { %p5398_p2 = pnand %p5396_p1, %p5393_p0 }
  0x16   :  { %5401 = shalt.err (!%p5398_p2)
}
  0x17   :  { %s5402_s21 = scalar_lea.vmem %s47_s25, 256  ;;  %p5407_p4 = scmp.lt.s32.totalorder %s47_s25, %s47_s25 }
  0x18   :  { %p5403_p3 = scmp.ne.s32.totalorder %s47_s25, %s5402_s21  ;;  %p5408_p5 = scmp.lt.s32.totalorder %s5402_s21, %s5402_s21 }
  0x1a   :  { %p5409_p6 = por %p5408_p5, %p5407_p4 }
  0x1c   :  { %p5410_p7 = pnand %p5409_p6, %p5403_p3 }
  0x1e   :  { %5413 = shalt.err (!%p5410_p7)
}
  0x1f   :  { %s6474_s22 = smov 128   ;;  %s5651_s23 = smov 8  }
  0x20   :  { %52 = dma.hbm_to_vmem [thread:$0]  %s6478_s0, 256, %s47_s25, [#allocation6], %s6474_s22, %s6474_s22, %s5651_s23  }
  0x21   :  { %s5414_s30 = scalar_lea.hbm %s6457_s3, 16 }
  0x22   :  { %p5415_p8 = scmp.ne.s32.totalorder %s6457_s3, %s5414_s30  ;;  %p5418_p9 = scmp.lt.u32.totalorder %s5414_s30, %s6457_s3 }
  0x24   :  { %p5420_p10 = pnand %p5418_p9, %p5415_p8 }
  0x26   :  { %5423 = shalt.err (!%p5420_p10)
}
  0x27   :  { %s5424_s21 = scalar_lea.vmem %s5757_s27, 16  ;;  %s5428_s25 = scalar_lea.vmem %s5757_s27, 32 }
  0x28   :  { %p5425_p11 = scmp.ne.s32.totalorder %s5757_s27, %s5424_s21  ;;  %p5429_p12 = scmp.lt.s32.totalorder %s5757_s27, %s5757_s27 }
  0x29   :  { %p5430_p13 = scmp.lt.s32.totalorder %s5428_s25, %s5424_s21 }
  0x2b   :  { %p5431_p0 = por %p5430_p13, %p5429_p12 }
  0x2d   :  { %p5432_p1 = pnand %p5431_p0, %p5425_p11 }
  0x2f   :  { %5435 = shalt.err (!%p5432_p1)
}
  0x30   :  { %74 = dma.hbm_to_vmem [thread:$0]  %s6457_s3, 16, %s5757_s27, [#allocation9]  }
  0x31   :  { %s5652_s26 = smov [#allocation11]   ;;  %s5653_s29 = smov [#allocation14]  }
  0x32   :  { %s93_s28 = sshll.u32 %s5652_s26, 4  ;;  %s116_s30 = sshll.u32 %s5653_s29, 4  ;;  %s94_s28 = int_to_ptr.vmem [resolvable:$true] %s93_s28  ;;  %s5792_s30 = int_to_ptr.vmem [resolvable:$true] %s116_s30 }
  0x33   :  { %s5436_s1 = scalar_lea.hbm %s6459_s5, 16 }
  0x34   :  { %p5437_p2 = scmp.ne.s32.totalorder %s6459_s5, %s5436_s1  ;;  %p5440_p3 = scmp.lt.u32.totalorder %s5436_s1, %s6459_s5 }
  0x36   :  { %p5442_p4 = pnand %p5440_p3, %p5437_p2 }
  0x38   :  { %5445 = shalt.err (!%p5442_p4)
}
  0x39   :  { %s5446_s3 = scalar_lea.vmem %s94_s28, 16  ;;  %s5450_s27 = scalar_lea.vmem %s94_s28, 32 }
  0x3a   :  { %p5447_p5 = scmp.ne.s32.totalorder %s94_s28, %s5446_s3  ;;  %p5451_p6 = scmp.lt.s32.totalorder %s94_s28, %s94_s28 }
  0x3b   :  { %p5452_p7 = scmp.lt.s32.totalorder %s5450_s27, %s5446_s3 }
  0x3d   :  { %p5453_p8 = por %p5452_p7, %p5451_p6 }
  0x3f   :  { %p5454_p9 = pnand %p5453_p8, %p5447_p5 }
  0x41   :  { %5457 = shalt.err (!%p5454_p9)
}
  0x42   :  { %96 = dma.hbm_to_vmem [thread:$0]  %s6459_s5, 16, %s94_s28, [#allocation12]  }
  0x43   :  { %s5458_s18 = scalar_lea.hbm %s6462_s8, 1024 }
  0x44   :  { %p5459_p10 = scmp.ne.s32.totalorder %s6462_s8, %s5458_s18  ;;  %p5462_p11 = scmp.lt.u32.totalorder %s5458_s18, %s6462_s8 }
  0x46   :  { %p5464_p12 = pnand %p5462_p11, %p5459_p10 }
  0x48   :  { %5467 = shalt.err (!%p5464_p12)
}
  0x49   :  { %s5468_s21 = scalar_lea.vmem %s5792_s30, 1024  ;;  %p5473_p0 = scmp.lt.s32.totalorder %s5792_s30, %s5792_s30 }
  0x4a   :  { %p5469_p13 = scmp.ne.s32.totalorder %s5792_s30, %s5468_s21  ;;  %p5474_p1 = scmp.lt.s32.totalorder %s5468_s21, %s5468_s21 }
  0x4c   :  { %p5475_p2 = por %p5474_p1, %p5473_p0 }
  0x4e   :  { %p5476_p3 = pnand %p5475_p2, %p5469_p13 }
  0x50   :  { %5479 = shalt.err (!%p5476_p3)
}
  0x51   :  { %s6479_s5 = smov 128   ;;  %s5654_s3 = smov [#allocation2]  }
  0x52   :  { %122 = dma.hbm_to_vmem [thread:$0]  %s6462_s8, 1024, %s5792_s30, [#allocation15], %s6479_s5, %s6479_s5, %s5651_s23  }
  0x53   :  { %s34_s27 = sshll.u32 %s5654_s3, 4  ;;  %s5655_s0 = smov [#allocation7]   ;;  %s35_s27 = int_to_ptr.vmem [resolvable:$true] %s34_s27 }
  0x54   :  { %s58_s24 = sshll.u32 %s5655_s0, 4  ;;  %s6480_s18 = sld [smem:[#allocation27_spill]]  ;;  %s5826_s24 = int_to_ptr.vmem [resolvable:$true] %s58_s24 }
  0x5a   :  { %s5480_s22 = scalar_lea.hbm %s6480_s18, 256 }
  0x5b   :  { %p5481_p4 = scmp.ne.s32.totalorder %s6480_s18, %s5480_s22  ;;  %p5484_p5 = scmp.lt.u32.totalorder %s5480_s22, %s6480_s18 }
  0x5d   :  { %p5486_p6 = pnand %p5484_p5, %p5481_p4 }
  0x5f   :  { %5489 = shalt.err (!%p5486_p6)
}
  0x60   :  { %s5490_s8 = scalar_lea.vmem %s35_s27, 256  ;;  %p5495_p8 = scmp.lt.s32.totalorder %s35_s27, %s35_s27 }
  0x61   :  { %p5491_p7 = scmp.ne.s32.totalorder %s35_s27, %s5490_s8  ;;  %p5496_p9 = scmp.lt.s32.totalorder %s5490_s8, %s5490_s8 }
  0x63   :  { %p5497_p10 = por %p5496_p9, %p5495_p8 }
  0x65   :  { %p5498_p11 = pnand %p5497_p10, %p5491_p7 }
  0x67   :  { %5501 = shalt.err (!%p5498_p11)
}
  0x68   :  { %40 = dma.hbm_to_vmem [thread:$0]  %s6480_s18, 256, %s35_s27, [#allocation3], %s6479_s5, %s6479_s5, %s5651_s23  }
  0x69   :  { %s5502_s0 = scalar_lea.hbm %s6456_s2, 256 }
  0x6a   :  { %p5503_p12 = scmp.ne.s32.totalorder %s6456_s2, %s5502_s0  ;;  %p5506_p13 = scmp.lt.u32.totalorder %s5502_s0, %s6456_s2 }
  0x6c   :  { %p5508_p0 = pnand %p5506_p13, %p5503_p12 }
  0x6e   :  { %5511 = shalt.err (!%p5508_p0)
}
  0x6f   :  { %s5512_s1 = scalar_lea.vmem %s5826_s24, 256  ;;  %p5517_p2 = scmp.lt.s32.totalorder %s5826_s24, %s5826_s24 }
  0x70   :  { %p5513_p1 = scmp.ne.s32.totalorder %s5826_s24, %s5512_s1  ;;  %p5518_p3 = scmp.lt.s32.totalorder %s5512_s1, %s5512_s1 }
  0x72   :  { %p5519_p4 = por %p5518_p3, %p5517_p2 }
  0x74   :  { %p5520_p5 = pnand %p5519_p4, %p5513_p1 }
  0x76   :  { %5523 = shalt.err (!%p5520_p5)
}
  0x77   :  { %64 = dma.hbm_to_vmem [thread:$0]  %s6456_s2, 256, %s5826_s24, [#allocation6], %s6479_s5, %s6479_s5, %s5651_s23  }
  0x78   :  { %s5656_s20 = smov [#allocation10]   ;;  %s5657_s8 = smov [#allocation13]  }
  0x79   :  { %s80_s21 = sshll.u32 %s5656_s20, 4  ;;  %s104_s30 = sshll.u32 %s5657_s8, 4  ;;  %s81_s21 = int_to_ptr.vmem [resolvable:$true] %s80_s21  ;;  %s5863_s30 = int_to_ptr.vmem [resolvable:$true] %s104_s30 }
  0x7a   :  { %s5524_s3 = scalar_lea.hbm %s6458_s4, 512 }
  0x7b   :  { %p5525_p6 = scmp.ne.s32.totalorder %s6458_s4, %s5524_s3  ;;  %p5528_p7 = scmp.lt.u32.totalorder %s5524_s3, %s6458_s4 }
  0x7d   :  { %p5530_p8 = pnand %p5528_p7, %p5525_p6 }
  0x7f   :  { %5533 = shalt.err (!%p5530_p8)
}
  0x80   :  { %s5534_s2 = scalar_lea.vmem %s81_s21, 512  ;;  %p5539_p10 = scmp.lt.s32.totalorder %s81_s21, %s81_s21 }
  0x81   :  { %p5535_p9 = scmp.ne.s32.totalorder %s81_s21, %s5534_s2  ;;  %p5540_p11 = scmp.lt.s32.totalorder %s5534_s2, %s5534_s2 }
  0x83   :  { %p5541_p12 = por %p5540_p11, %p5539_p10 }
  0x85   :  { %p5542_p13 = pnand %p5541_p12, %p5535_p9 }
  0x87   :  { %5545 = shalt.err (!%p5542_p13)
}
  0x88   :  { %86 = dma.hbm_to_vmem [thread:$0]  %s6458_s4, 512, %s81_s21, [#allocation9], %s6479_s5, %s6479_s5, %s5651_s23  }
  0x89   :  { %s5546_s18 = scalar_lea.hbm %s6461_s7, 96 }
  0x8a   :  { %p5547_p0 = scmp.ne.s32.totalorder %s6461_s7, %s5546_s18  ;;  %p5550_p1 = scmp.lt.u32.totalorder %s5546_s18, %s6461_s7 }
  0x8c   :  { %p5552_p2 = pnand %p5550_p1, %p5547_p0 }
  0x8e   :  { %5555 = shalt.err (!%p5552_p2)
}
  0x8f   :  { %s5556_s3 = scalar_lea.vmem %s5863_s30, 96  ;;  %p5561_p4 = scmp.lt.s32.totalorder %s5863_s30, %s5863_s30 }
  0x90   :  { %p5557_p3 = scmp.ne.s32.totalorder %s5863_s30, %s5556_s3  ;;  %p5562_p5 = scmp.lt.s32.totalorder %s5556_s3, %s5556_s3 }
  0x92   :  { %p5563_p6 = por %p5562_p5, %p5561_p4 }
  0x94   :  { %p5564_p7 = pnand %p5563_p6, %p5557_p3 }
  0x96   :  { %5567 = shalt.err (!%p5564_p7)
}
  0x97   :  { %s5658_s4 = smov 16   ;;  %s5659_s21 = smov 1  }
  0x98   :  { %110 = dma.hbm_to_vmem [thread:$0]  %s6461_s7, 96, %s5863_s30, [#allocation12], %s5658_s4, %s5658_s4, %s5659_s21  }
  0x99   :  { %s5660_s29 = smov [#allocation16]   ;;  %s5661_s2 = smov [#allocation17]  }
  0x9a   :  { %s130_s22 = sshll.u32 %s5660_s29, 4  ;;  %s142_s24 = sshll.u32 %s5661_s2, 4  ;;  %s131_s22 = int_to_ptr.vmem [resolvable:$true] %s130_s22  ;;  %s5897_s24 = int_to_ptr.vmem [resolvable:$true] %s142_s24 }
  0x9b   :  { %s5568_s27 = scalar_lea.hbm %s6464_s10, 128 }
  0x9c   :  { %p5569_p8 = scmp.ne.s32.totalorder %s6464_s10, %s5568_s27  ;;  %p5572_p9 = scmp.lt.u32.totalorder %s5568_s27, %s6464_s10 }
  0x9e   :  { %p5574_p10 = pnand %p5572_p9, %p5569_p8 }
  0xa0   :  { %5577 = shalt.err (!%p5574_p10)
}
  0xa1   :  { %s5578_s7 = scalar_lea.vmem %s131_s22, 128  ;;  %p5583_p12 = scmp.lt.s32.totalorder %s131_s22, %s131_s22 }
  0xa2   :  { %p5579_p11 = scmp.ne.s32.totalorder %s131_s22, %s5578_s7  ;;  %p5584_p13 = scmp.lt.s32.totalorder %s5578_s7, %s5578_s7 }
  0xa4   :  { %p5585_p0 = por %p5584_p13, %p5583_p12 }
  0xa6   :  { %p5586_p1 = pnand %p5585_p0, %p5579_p11 }
  0xa8   :  { %5589 = shalt.err (!%p5586_p1)
}
  0xa9   :  { %136 = dma.hbm_to_vmem [thread:$0]  %s6464_s10, 128, %s131_s22, [#allocation15], %s5658_s4, %s5658_s4, %s5659_s21  }
  0xaa   :  { %s5590_s26 = scalar_lea.hbm %s6465_s11, 1024 }
  0xab   :  { %p5591_p2 = scmp.ne.s32.totalorder %s6465_s11, %s5590_s26  ;;  %p5594_p3 = scmp.lt.u32.totalorder %s5590_s26, %s6465_s11 }
  0xad   :  { %p5596_p4 = pnand %p5594_p3, %p5591_p2 }
  0xaf   :  { %5599 = shalt.err (!%p5596_p4)
}
  0xb0   :  { %s5600_s27 = scalar_lea.vmem %s5897_s24, 1024  ;;  %p5605_p6 = scmp.lt.s32.totalorder %s5897_s24, %s5897_s24 }
  0xb1   :  { %p5601_p5 = scmp.ne.s32.totalorder %s5897_s24, %s5600_s27  ;;  %p5606_p7 = scmp.lt.s32.totalorder %s5600_s27, %s5600_s27 }
  0xb3   :  { %p5607_p8 = por %p5606_p7, %p5605_p6 }
  0xb5   :  { %p5608_p9 = pnand %p5607_p8, %p5601_p5 }
  0xb7   :  { %5611 = shalt.err (!%p5608_p9)
}
  0xb8   :  { %148 = dma.hbm_to_vmem [thread:$0]  %s6465_s11, 1024, %s5897_s24, [#allocation18], %s6479_s5, %s6479_s5, %s5651_s23  }
  0xb9   :  { %5634 = dma.done.wait [#allocation3], 256  }
  0xba   :  { %5635 = vsyncadd [#allocation3], 4294967040 }
  0xbb   :  { %5636 = dma.done.wait [#allocation6], 512  }
  0xbc   :  { %5637 = vsyncadd [#allocation6], 4294966784 }
  0xbd   :  { %5638 = dma.done.wait [#allocation9], 528  }
  0xbe   :  { %5639 = vsyncadd [#allocation9], 4294966768 }
  0xbf   :  { %5640 = dma.done.wait [#allocation12], 112  }
  0xc0   :  { %5641 = vsyncadd [#allocation12], 4294967184 }
  0xc1   :  { %5642 = dma.done.wait [#allocation15], 1152  }
  0xc2   :  { %5643 = vsyncadd [#allocation15], 4294966144 }
  0xc3   :  { %5644 = dma.done.wait [#allocation18], 1024  }
  0xc4   :  { %5645 = vsyncadd [#allocation18], 4294966272  ;;  %vm200_vm0 = vcmask 130048   ;;  %v191_v0 = vld [vmem:[#allocation7] sm:$0xff]  ;;  %v192_v1 = vld [vmem:[#allocation7 + $0x8] sm:$0xff]  ;;  %vm295_vm1 = vcmask 261120   ;;  %v383_v48 = vlaneseq }
  0xc5   :  { %v189_v2 = vld [vmem:[#allocation2] sm:$0xff]  ;;  %v5160_v3 = vpack.c.bf16 %v192_v1, %v191_v0  ;;  %v284_v4 = vld [vmem:[#allocation10] sm:$0xff]  ;;  %v190_v7 = vld [vmem:[#allocation2 + $0x8] sm:$0xff]  ;;  %v5662_v33 = vmov 0.0   ;;  %vm5663_vm2 = vmmov 0   ;;  %vm1322_vm6 = vcmask 64512  }
  0xc6   :  { %4820 = vmatprep.mubr.msk.f32.mxu0 %vm200_vm0, %v189_v2  ;;  %v285_v5 = vld [vmem:[#allocation10 + $0x8] sm:$0xff]  ;;  %v286_v8 = vld [vmem:[#allocation10 + $0x10] sm:$0xff]  ;;  %v287_v9 = vld [vmem:[#allocation10 + $0x18] sm:$0xff]  ;;  %v384_v49 = vshrl.u32 %v383_v48, 7  ;;  %v386_v51 = vand.u32 127, %v383_v48  ;;  %vm2258_vm7 = vcmask 523264  }
  0xc7   :  { %v5164_v6 = vpack.c.bf16 %v285_v5, %v284_v4  ;;  %5161 = vmatprep.subr.bf16.mxu0 %v5160_v3  ;;  %v5168_v10 = vpack.c.bf16 %v287_v9, %v286_v8  ;;  %v4521_v11 = vld [vmem:[#allocation8] ss:$0 sm:$0xff]  ;;  %v420_v18 = vld [vmem:[%s6460_s6] sm:$0xff]  ;;  %v421_v19 = vld [vmem:[%s6460_s6 + $0x8] sm:$0xff]  ;;  %v5664_v54 = vmov 1966171168  }
  0xc8   :  { %5163 = vmatpush3.bf16.msra.mxu0 %v5160_v3  ;;  %v5172_v20 = vpack.c.bf16 %v421_v19, %v420_v18  ;;  %v4531_v21 = vld [vmem:[%s6460_s6 + $0x20] sm:$0xff]  ;;  %v4532_v22 = vld [vmem:[%s6460_s6 + $0x28] sm:$0xff]  ;;  %v422_v24 = vld [vmem:[%s6460_s6 + $0x10] sm:$0xff]  ;;  %v389_v50 = vadd.s32 1, %v384_v49  ;;  %v387_v52 = vmul.u32 8, %v384_v49  ;;  %v397_v55 = vunpack.c.l.s4 %v5664_v54  ;;  %s5666_s21 = smov [#allocation19]  }
  0xc9   :  { %5165 = vmatprep.subr.bf16.mxu1 %v5164_v6  ;;  %v5180_v23 = vpack.c.bf16 %v4532_v22, %v4531_v21  ;;  %v423_v25 = vld [vmem:[%s6460_s6 + $0x18] sm:$0xff]  ;;  %v4533_v27 = vld [vmem:[%s6460_s6 + $0x30] sm:$0xff]  ;;  %v4538_v30 = vld [vmem:[%s6460_s6 + $0x40] sm:$0xff]  ;;  %v690_v62 = vsub.s32 0, %v384_v49  ;;  %s4507_s22 = sshll.u32 %s5666_s21, 4  ;;  %s4508_s22 = int_to_ptr.vmem [resolvable:$true] %s4507_s22 }
  0xca   :  { %5167 = vmatpush3.bf16.msra.mxu1 %v5164_v6  ;;  %5173 = vmatprep.subr.bf16.mxu0 %v5172_v20  ;;  %v5176_v26 = vpack.c.bf16 %v423_v25, %v422_v24  ;;  %v4534_v28 = vld [vmem:[%s6460_s6 + $0x38] sm:$0xff]  ;;  %v4539_v31 = vld [vmem:[%s6460_s6 + $0x48] sm:$0xff]  ;;  %v4524_v34 = vld [vmem:[#allocation11] ss:$0 sm:$0xff]  ;;  %v390_v53 = vmul.u32 8, %v389_v50  ;;  %vm5993_vm3 = vcmp.ge.s32.totalorder %v386_v51, %v387_v52  ;;  %v398_v58 = vunpack.c.0.s8 %v397_v55  ;;  %p5617_p11 = scmp.lt.s32.totalorder %s4508_s22, %s4508_s22 }
  0xcb   :  { %4821 = vmatmul.mubr.msk.f32.vlgmr.msra.gmra.mrb[0].mxu0 %vm200_vm0, %v190_v7  ;;  %5169 = vmatprep.subr.bf16.mxu1 %v5168_v10  ;;  %v5184_v29 = vpack.c.bf16 %v4534_v28, %v4533_v27  ;;  %v5188_v32 = vpack.c.bf16 %v4539_v31, %v4538_v30  ;;  %v379_v40 = vld [vmem:[#allocation5] sm:$0xff]  ;;  %v380_v41 = vld [vmem:[#allocation5 + $0x8] sm:$0xff] }
  0xcc   :  { %5175 = vmatpush3.bf16.msra.mxu0 %v5172_v20  ;;  %v4540_v43 = vld [vmem:[%s6460_s6 + $0x50] sm:$0xff]  ;;  %v4541_v44 = vld [vmem:[%s6460_s6 + $0x58] sm:$0xff]  ;;  %vm5997_vm4 = vcmp.lt.s32.totalorder %v386_v51, %v390_v53  ;;  %v401_v59 = vsub.s32 %v398_v58, %v384_v49 }
  0xcd   :  { %5177 = vmatprep.subr.bf16.mxu0 %v5176_v26  ;;  %v5192_v47 = vpack.c.bf16 %v4541_v44, %v4540_v43  ;;  %vm392_vm5 = vmand %vm5993_vm3, %vm5997_vm4  ;;  %v4528_v1 = vld [vmem:[#allocation13] ss:$0 sm:$0xff]  ;;  %v4535_v2 = vld [vmem:[#allocation13 + $0x1] ss:$0 sm:$0xff] }
  0xce   :  { %5171 = vmatpush3.bf16.msra.mxu1 %v5168_v10  ;;  %v4527_v60 = vsel %vm392_vm5, 1.0, %v5662_v33 }
  0xcf   :  { %5181 = vmatprep.subr.bf16.mxu1 %v5180_v23  ;;  %v402_v61 = vrot.slane %v4527_v60, %v401_v59 }
  0xd0   :  { %5179 = vmatpush3.bf16.msra.mxu0 %v5176_v26 }
  0xd1   :  { %5189 = vmatprep.subr.bf16.mxu0 %v5188_v32  ;;  %v410_v63 = vrot.slane %v402_v61, %v401_v59  ;;  %v403_v0 = vcombine.high %v402_v61, %v402_v61 }
  0xd3   :  { %v6011_v3 = vrot.slane %v410_v63, %v690_v62  ;;  %v417_v10 = vrot.slane %v403_v0, %v401_v59 }
 0x19e   :  { %v4822_v12 = vpop.f32.mrb[0].mxu0 }
 0x19f   :  { %v279_v13 = vadd.f32 %v4822_v12, %v4521_v11  ;;  %v273_v14 = vpop.f32.mrb[1].mxu0 }
 0x1a0   :  { %v274_v15 = vadd.f32 %v4521_v11, %v273_v14  ;;  %v418_v14 = vcombine.high %v410_v63, %v410_v63 }
 0x1a1   :  { %v283_v17 = vmax.f32 %v279_v13, 0.0 }
 0x1a2   :  { %v282_v16 = vmax.f32 %v274_v15, 0.0  ;;  %v6015_v15 = vrot.slane %v417_v10, %v690_v62  ;;  %v6024_v18 = vrot.slane %v418_v14, %v690_v62 }
 0x1a4   :  { %4831 = vmatprep.mubr.msk.f32.mxu1 %vm295_vm1, %v282_v16 }
 0x1a5   :  { %4832 = vmatmul.mubr.msk.f32.vlgmr.msra.gmra.mrb[0].mxu1 %vm295_vm1, %v283_v17  ;;  %v419_v17 = vcombine.high %v417_v10, %v417_v10 }
 0x1a6   :  { %5183 = vmatpush3.bf16.msra.mxu1 %v5180_v23  ;;  %v4542_v23 = vld [vmem:[#allocation13 + $0x2] ss:$0 sm:$0xff] }
 0x1a7   :  { %5185 = vmatprep.subr.bf16.mxu1 %v5184_v29  ;;  %v6038_v24 = vrot.slane %v419_v17, %v690_v62 }
 0x1aa   :  { %5187 = vmatpush3.bf16.msra.mxu1 %v5184_v29 }
 0x1ab   :  { %4867 = vmatprep.subr.mxu1 %v5662_v33 }
 0x278   :  { %v4833_v35 = vpop.f32.mrb[0].mxu1 }
 0x279   :  { %v374_v36 = vadd.f32 %v4833_v35, %v4524_v34  ;;  %v368_v37 = vpop.f32.mrb[1].mxu1 }
 0x27a   :  { %v369_v38 = vadd.f32 %v4524_v34, %v368_v37 }
 0x27b   :  { %v378_v39 = vmul.f32 5.656854, %v374_v36 }
 0x27c   :  { %v377_v42 = vmul.f32 5.656854, %v369_v38 }
 0x27d   :  { %v5974_v46 = vadd.f32 %v380_v41, %v378_v39 }
 0x27e   :  { %v5972_v45 = vadd.f32 %v379_v40, %v377_v42 }
 0x280   :  { %4842 = vmatprep.mubr.msk.f32.mxu0 %vm295_vm1, %v5972_v45  ;;  %4853 = vmatprep.mubr.msk.f32.mxu1 %vm295_vm1, %v5972_v45 }
 0x281   :  { %4843 = vmatmul.mubr.msk.f32.vlgmr.msra.gmra.mrb[2].mxu0 %vm295_vm1, %v5974_v46  ;;  %4854 = vmatmul.mubr.msk.f32.vlgmr.msra.gmra.mrb[2].mxu1 %vm295_vm1, %v5974_v46 }
 0x282   :  { %5191 = vmatpush3.bf16.msra.mxu0 %v5188_v32  ;;  %4864 = vmatprep.mubr.msk.f32.mxu0 %vm295_vm1, %v5972_v45 }
 0x283   :  { %5193 = vmatprep.subr.bf16.mxu0 %v5192_v47  ;;  %4869 = vmatprep.mubr.msk.f32.mxu1 %vm5663_vm2, %v5662_v33 }
 0x286   :  { %5195 = vmatpush3.bf16.msra.mxu0 %v5192_v47 }
 0x287   :  { %4872 = vmatprep.subr.mxu0 %v5662_v33 }
 0x289   :  { %4865 = vmatmul.mubr.msk.f32.vlgmr.msra.gmra.mrb[4].mxu0 %vm295_vm1, %v5974_v46 }
 0x28a   :  { %4874 = vmatprep.mubr.msk.f32.mxu0 %vm5663_vm2, %v5662_v33 }
 0x354   :  { %v4844_v4 = vpop.f32.mrb[2].mxu0  ;;  %v4855_v5 = vpop.f32.mrb[2].mxu1 }
 0x355   :  { %v509_v6 = vadd.f32 %v4844_v4, %v4528_v1  ;;  %v597_v7 = vadd.f32 %v4855_v5, %v4535_v2  ;;  %v503_v8 = vpop.f32.mrb[3].mxu0  ;;  %v591_v9 = vpop.f32.mrb[3].mxu1 }
 0x356   :  { %v504_v11 = vadd.f32 %v4528_v1, %v503_v8  ;;  %v592_v12 = vadd.f32 %v4535_v2, %v591_v9 }
 0x357   :  { %v709_v13 = vmul.f32 %v6011_v3, %v509_v6  ;;  %4873 = vmatpush3.xpose.msk.msra.mxu0 %vm295_vm1, %v597_v7  ;;  %v711_v19 = vmul.f32 %v6015_v15, %v509_v6  ;;  %v713_v25 = vmul.f32 %v6024_v18, %v509_v6  ;;  %v715_v29 = vmul.f32 %v6038_v24, %v509_v6 }
 0x358   :  { %v708_v16 = vmul.f32 %v6011_v3, %v504_v11  ;;  %4868 = vmatpush3.xpose.msk.msra.mxu1 %vm295_vm1, %v592_v12  ;;  %4882 = vmatprep.subr.mxu0 %v5662_v33  ;;  %v710_v21 = vmul.f32 %v6015_v15, %v504_v11  ;;  %v712_v26 = vmul.f32 %v6024_v18, %v504_v11 }
 0x359   :  { %4877 = vmatprep.subr.mxu1 %v5662_v33  ;;  %v714_v30 = vmul.f32 %v6038_v24, %v504_v11 }
 0x35a   :  { %4875 = vmatmul.mubr.msk.f32.vlgmr.msra.gmra.mrb[6].mxu0 %vm295_vm1, %v709_v13 }
 0x35b   :  { %4870 = vmatmul.mubr.msk.f32.vlgmr.msra.gmra.mrb[4].mxu1 %vm295_vm1, %v708_v16  ;;  %4883 = vmatpush3.xpose.msk.msra.mxu0 %vm295_vm1, %v597_v7 }
 0x35c   :  { %v4866_v20 = vpop.f32.mrb[4].mxu0  ;;  %4878 = vmatpush3.xpose.msk.msra.mxu1 %vm295_vm1, %v592_v12  ;;  %4884 = vmatprep.mubr.msk.f32.mxu0 %vm5663_vm2, %v5662_v33 }
 0x35d   :  { %v679_v22 = vpop.f32.mrb[5].mxu0  ;;  %4879 = vmatprep.mubr.msk.f32.mxu1 %vm5663_vm2, %v5662_v33  ;;  %4892 = vmatprep.subr.mxu0 %v5662_v33  ;;  %v6045_v27 = vadd.f32 %v4866_v20, %v4542_v23 }
 0x35e   :  { %4885 = vmatmul.mubr.msk.f32.vlgmr.msra.gmra.mrb[8].mxu0 %vm295_vm1, %v711_v19  ;;  %4887 = vmatprep.subr.mxu1 %v5662_v33  ;;  %v6050_v28 = vadd.f32 %v4542_v23, %v679_v22 }
 0x35f   :  { %4880 = vmatmul.mubr.msk.f32.vlgmr.msra.gmra.mrb[6].mxu1 %vm295_vm1, %v710_v21  ;;  %4893 = vmatpush3.xpose.msk.msra.mxu0 %vm295_vm1, %v597_v7  ;;  %v717_v31 = vmul.f32 %v6011_v3, %v6045_v27 }
 0x360   :  { %4888 = vmatpush3.xpose.msk.msra.mxu1 %vm295_vm1, %v592_v12  ;;  %4894 = vmatprep.mubr.msk.f32.mxu0 %vm5663_vm2, %v5662_v33  ;;  %v716_v32 = vmul.f32 %v6011_v3, %v6050_v28 }
 0x361   :  { %4889 = vmatprep.mubr.msk.f32.mxu1 %vm5663_vm2, %v5662_v33  ;;  %4902 = vmatprep.subr.mxu0 %v5662_v33 }
 0x362   :  { %4895 = vmatmul.mubr.msk.f32.vlgmr.msra.gmra.mrb[10].mxu0 %vm295_vm1, %v713_v25  ;;  %4897 = vmatprep.subr.mxu1 %v5662_v33 }
 0x363   :  { %4890 = vmatmul.mubr.msk.f32.vlgmr.msra.gmra.mrb[8].mxu1 %vm295_vm1, %v712_v26  ;;  %4903 = vmatpush3.xpose.msk.msra.mxu0 %vm295_vm1, %v597_v7 }
 0x364   :  { %4898 = vmatpush3.xpose.msk.msra.mxu1 %vm295_vm1, %v592_v12  ;;  %4904 = vmatprep.mubr.msk.f32.mxu0 %vm5663_vm2, %v5662_v33 }
 0x365   :  { %4899 = vmatprep.mubr.msk.f32.mxu1 %vm5663_vm2, %v5662_v33  ;;  %4912 = vmatprep.subr.mxu0 %v5662_v33 }
 0x366   :  { %4905 = vmatmul.mubr.msk.f32.vlgmr.msra.gmra.mrb[12].mxu0 %vm295_vm1, %v715_v29  ;;  %4907 = vmatprep.subr.mxu1 %v5662_v33 }
 0x367   :  { %4900 = vmatmul.mubr.msk.f32.vlgmr.msra.gmra.mrb[10].mxu1 %vm295_vm1, %v714_v30  ;;  %4913 = vmatpush3.msra.mxu0 %v717_v31 }
 0x368   :  { %4908 = vmatpush3.msra.mxu1 %v716_v32  ;;  %4909 = vmatprep.mubr.msk.f32.mxu1 %vm5663_vm2, %v5662_v33 }
 0x369   :  { %4917 = vmatprep.subr.mxu1 %v5662_v33  ;;  %4914 = vmatprep.mubr.msk.f32.mxu0 %vm5663_vm2, %v5662_v33 }
 0x36a   :  { %4922 = vmatprep.subr.mxu0 %v5662_v33 }
 0x42d   :  { %v872_v34 = vpop.f32.mrb[6].mxu0 }
 0x42e   :  { %v796_v35 = vpop.f32.mrb[4].mxu1  ;;  %v4876_v36 = vpop.f32.mrb[7].mxu0  ;;  %v1315_v39 = vmul.f32 0.35355338, %v872_v34 }
 0x42f   :  { %v1314_v37 = vmul.f32 0.35355338, %v796_v35  ;;  %v4871_v38 = vpop.f32.mrb[5].mxu1 }
 0x430   :  { %v1326_v50 = vsel %vm1322_vm6, %v1315_v39, -inf }
 0x431   :  { %v1018_v40 = vpop.f32.mrb[8].mxu0  ;;  %v1323_v41 = vsel %vm1322_vm6, %v1314_v37, -inf }
 0x432   :  { %v4886_v42 = vpop.f32.mrb[9].mxu0  ;;  %1324 = vmax.xlane.f32.xlu0 %v1323_v41  ;;  %v945_v43 = vpop.f32.mrb[6].mxu1  ;;  %v1317_v48 = vmul.f32 0.35355338, %v1018_v40 }
 0x433   :  { %v1316_v44 = vmul.f32 0.35355338, %v945_v43  ;;  %v4881_v47 = vpop.f32.mrb[7].mxu1 }
 0x434   :  { %v1332_v60 = vsel %vm1322_vm6, %v1317_v48, -inf }
 0x435   :  { %v1164_v49 = vpop.f32.mrb[10].mxu0  ;;  %v1329_v51 = vsel %vm1322_vm6, %v1316_v44, -inf }
 0x436   :  { %v4896_v52 = vpop.f32.mrb[11].mxu0  ;;  %1327 = vmax.xlane.f32.xlu0 %v1326_v50  ;;  %1330 = vmax.xlane.f32.xlu1 %v1329_v51  ;;  %v1091_v53 = vpop.f32.mrb[8].mxu1  ;;  %v1319_v58 = vmul.f32 0.35355338, %v1164_v49 }
 0x437   :  { %v1318_v54 = vmul.f32 0.35355338, %v1091_v53  ;;  %v4891_v55 = vpop.f32.mrb[9].mxu1 }
 0x438   :  { %v1338_v4 = vsel %vm1322_vm6, %v1319_v58, -inf }
 0x439   :  { %v1310_v59 = vpop.f32.mrb[12].mxu0  ;;  %v1335_v61 = vsel %vm1322_vm6, %v1318_v54, -inf }
 0x43a   :  { %v4906_v62 = vpop.f32.mrb[13].mxu0  ;;  %1333 = vmax.xlane.f32.xlu1 %v1332_v60  ;;  %1336 = vmax.xlane.f32.xlu0 %v1335_v61  ;;  %v1237_v63 = vpop.f32.mrb[10].mxu1  ;;  %v1321_v2 = vmul.f32 0.35355338, %v1310_v59 }
 0x43b   :  { %v1320_v0 = vmul.f32 0.35355338, %v1237_v63  ;;  %v4901_v1 = vpop.f32.mrb[11].mxu1 }
 0x43c   :  { %v1344_v6 = vsel %vm1322_vm6, %v1321_v2, -inf }
 0x43d   :  { %v1341_v5 = vsel %vm1322_vm6, %v1320_v0, -inf }
 0x43e   :  { %1339 = vmax.xlane.f32.xlu1 %v1338_v4  ;;  %1342 = vmax.xlane.f32.xlu0 %v1341_v5 }
 0x442   :  { %1345 = vmax.xlane.f32.xlu1 %v1344_v6 }
 0x4bf   :  { %v1325_v7 = vpop.xlane.xlu0 %1324 }
 0x4c0   :  { %v1347_v8 = vsub.f32 %v1314_v37, %v1325_v7 }
 0x4c2   :  { %v1355_v9 = vmul.f32 1.442695, %v1347_v8 }
 0x4c3   :  { %v1328_v10 = vpop.xlane.xlu0 %1327  ;;  %v1331_v11 = vpop.xlane.xlu1 %1330 }
 0x4c4   :  { %5312 = vpow2.f32 %v1355_v9  ;;  %v1348_v12 = vsub.f32 %v1315_v39, %v1328_v10  ;;  %v1349_v13 = vsub.f32 %v1316_v44, %v1331_v11  ;;  %v719_v9 = vmul.f32 %v6015_v15, %v6045_v27 }
 0x4c5   :  { %v720_v10 = vmul.f32 %v6024_v18, %v6050_v28 }
 0x4c6   :  { %v1357_v14 = vmul.f32 1.442695, %v1348_v12  ;;  %v1359_v16 = vmul.f32 1.442695, %v1349_v13 }
 0x4c7   :  { %v1334_v17 = vpop.xlane.xlu1 %1333  ;;  %v1337_v19 = vpop.xlane.xlu0 %1336 }
 0x4c8   :  { %5314 = vpow2.f32 %v1357_v14  ;;  %v1350_v20 = vsub.f32 %v1317_v48, %v1334_v17  ;;  %v1351_v21 = vsub.f32 %v1318_v54, %v1337_v19  ;;  %v722_v17 = vmul.f32 %v6038_v24, %v6050_v28 }
 0x4c9   :  { %5316 = vpow2.f32 %v1359_v16  ;;  %v721_v16 = vmul.f32 %v6024_v18, %v6045_v27 }
 0x4ca   :  { %v1361_v22 = vmul.f32 1.442695, %v1350_v20  ;;  %v1363_v23 = vmul.f32 1.442695, %v1351_v21 }
 0x4cb   :  { %v1340_v25 = vpop.xlane.xlu1 %1339  ;;  %v1343_v26 = vpop.xlane.xlu0 %1342 }
 0x4cc   :  { %5318 = vpow2.f32 %v1361_v22  ;;  %v1352_v29 = vsub.f32 %v1319_v58, %v1340_v25  ;;  %v1353_v30 = vsub.f32 %v1320_v0, %v1343_v26  ;;  %v2009_v26 = vld [vmem:[#allocation14] sm:$0xff] }
 0x4cd   :  { %5320 = vpow2.f32 %v1363_v23  ;;  %v723_v23 = vmul.f32 %v6038_v24, %v6045_v27 }
 0x4ce   :  { %v5313_v31 = vpop.eup %5312  ;;  %v1365_v32 = vmul.f32 1.442695, %v1352_v29  ;;  %v1367_v34 = vmul.f32 1.442695, %v1353_v30  ;;  %v2010_v29 = vld [vmem:[#allocation14 + $0x8] sm:$0xff] }
 0x4cf   :  { %v1346_v35 = vpop.xlane.xlu1 %1345  ;;  %v1371_v36 = vsel %vm1322_vm6, %v5313_v31, 0.0  ;;  %v5196_v30 = vpack.c.bf16 %v2010_v29, %v2009_v26  ;;  %v2151_v26 = vld [vmem:[#allocation17 + $0x10] sm:$0xff] }
 0x4d0   :  { %5322 = vpow2.f32 %v1365_v32  ;;  %v1354_v37 = vsub.f32 %v1321_v2, %v1346_v35  ;;  %1372 = vadd.xlane.f32.xlu0 %v1371_v36  ;;  %v718_v2 = vmul.f32 %v6015_v15, %v6050_v28  ;;  %v2012_v32 = vld [vmem:[#allocation14 + $0x18] sm:$0xff] }
 0x4d1   :  { %5324 = vpow2.f32 %v1367_v34 }
 0x4d2   :  { %v5315_v38 = vpop.eup %5314  ;;  %v1369_v39 = vmul.f32 1.442695, %v1354_v37 }
 0x4d3   :  { %v5317_v40 = vpop.eup %5316  ;;  %v1374_v41 = vsel %vm1322_vm6, %v5315_v38, 0.0 }
 0x4d4   :  { %5326 = vpow2.f32 %v1369_v39  ;;  %1375 = vadd.xlane.f32.xlu1 %v1374_v41  ;;  %v1377_v42 = vsel %vm1322_vm6, %v5317_v40, 0.0 }
 0x4d5   :  { %1378 = vadd.xlane.f32.xlu0 %v1377_v42 }
 0x4d6   :  { %v5319_v43 = vpop.eup %5318 }
 0x4d7   :  { %v5321_v44 = vpop.eup %5320  ;;  %v1380_v47 = vsel %vm1322_vm6, %v5319_v43, 0.0 }
 0x4d8   :  { %1381 = vadd.xlane.f32.xlu1 %v1380_v47  ;;  %v1383_v48 = vsel %vm1322_vm6, %v5321_v44, 0.0 }
 0x4d9   :  { %1384 = vadd.xlane.f32.xlu0 %v1383_v48 }
 0x4da   :  { %v5323_v49 = vpop.eup %5322 }
 0x4db   :  { %v5325_v50 = vpop.eup %5324  ;;  %v1386_v51 = vsel %vm1322_vm6, %v5323_v49, 0.0 }
 0x4dc   :  { %1387 = vadd.xlane.f32.xlu1 %v1386_v51  ;;  %v1389_v52 = vsel %vm1322_vm6, %v5325_v50, 0.0 }
 0x4dd   :  { %1390 = vadd.xlane.f32.xlu0 %v1389_v52 }
 0x4de   :  { %v5327_v53 = vpop.eup %5326 }
 0x4df   :  { %v1392_v54 = vsel %vm1322_vm6, %v5327_v53, 0.0 }
 0x4e0   :  { %1393 = vadd.xlane.f32.xlu1 %v1392_v54 }
 0x55d   :  { %v1373_v55 = vpop.xlane.xlu0 %1372 }
 0x55e   :  { %5328 = vrcp.f32 %v1373_v55 }
 0x561   :  { %v1376_v58 = vpop.xlane.xlu1 %1375 }
 0x562   :  { %5330 = vrcp.f32 %v1376_v58  ;;  %v1379_v59 = vpop.xlane.xlu0 %1378 }
 0x563   :  { %5332 = vrcp.f32 %v1379_v59 }
 0x565   :  { %v1382_v60 = vpop.xlane.xlu1 %1381 }
 0x566   :  { %5334 = vrcp.f32 %v1382_v60  ;;  %v1385_v61 = vpop.xlane.xlu0 %1384 }
 0x567   :  { %5336 = vrcp.f32 %v1385_v61 }
 0x568   :  { %v5329_v62 = vpop.eup %5328 }
 0x569   :  { %v1403_v63 = vmul.f32 %v5329_v62, %v5313_v31  ;;  %v1388_v0 = vpop.xlane.xlu1 %1387  ;;  %v2011_v31 = vld [vmem:[#allocation14 + $0x10] sm:$0xff] }
 0x56a   :  { %5338 = vrcp.f32 %v1388_v0  ;;  %v1391_v1 = vpop.xlane.xlu0 %1390  ;;  %v5200_v27 = vpack.c.bf16 %v2012_v32, %v2011_v31  ;;  %v2243_v32 = vld [vmem:[%s6467_s13] sm:$0xff] }
 0x56b   :  { %5340 = vrcp.f32 %v1391_v1  ;;  %4910 = vmatmul.mubr.msk.f32.vlgmr.msra.gmra.mrb[12].mxu1 %vm1322_vm6, %v1403_v63 }
 0x56c   :  { %v5331_v4 = vpop.eup %5330  ;;  %4918 = vmatpush3.msra.mxu1 %v718_v2  ;;  %4919 = vmatprep.mubr.msk.f32.mxu1 %vm5663_vm2, %v5662_v33 }
 0x56d   :  { %v5333_v5 = vpop.eup %5332  ;;  %v1404_v6 = vmul.f32 %v5331_v4, %v5315_v38  ;;  %v1394_v7 = vpop.xlane.xlu1 %1393  ;;  %4927 = vmatprep.subr.mxu1 %v5662_v33 }
 0x56e   :  { %v1405_v8 = vmul.f32 %v5333_v5, %v5317_v40  ;;  %5342 = vrcp.f32 %v1394_v7  ;;  %v4569_v5 = vld [vmem:[%s6463_s9] ss:$0 sm:$0xff] }
 0x56f   :  { %4915 = vmatmul.mubr.msk.f32.vlgmr.msra.gmra.mrb[14].mxu0 %vm1322_vm6, %v1404_v6 }
 0x570   :  { %v5335_v11 = vpop.eup %5334  ;;  %4920 = vmatmul.mubr.msk.f32.vlgmr.msra.gmra.mrb[14].mxu1 %vm1322_vm6, %v1405_v8  ;;  %4923 = vmatpush3.msra.mxu0 %v719_v9 }
 0x571   :  { %v5337_v12 = vpop.eup %5336  ;;  %v1406_v13 = vmul.f32 %v5335_v11, %v5319_v43  ;;  %4928 = vmatpush3.msra.mxu1 %v720_v10  ;;  %4924 = vmatprep.mubr.msk.f32.mxu0 %vm5663_vm2, %v5662_v33 }
 0x572   :  { %v1407_v14 = vmul.f32 %v5337_v12, %v5321_v44  ;;  %4929 = vmatprep.mubr.msk.f32.mxu1 %vm5663_vm2, %v5662_v33  ;;  %4932 = vmatprep.subr.mxu0 %v5662_v33 }
 0x573   :  { %4937 = vmatprep.subr.mxu1 %v5662_v33  ;;  %4925 = vmatmul.mubr.msk.f32.vlgmr.msra.gmra.mrb[16].mxu0 %vm1322_vm6, %v1406_v13 }
 0x574   :  { %v5339_v19 = vpop.eup %5338  ;;  %4930 = vmatmul.mubr.msk.f32.vlgmr.msra.gmra.mrb[16].mxu1 %vm1322_vm6, %v1407_v14  ;;  %4933 = vmatpush3.msra.mxu0 %v721_v16 }
 0x575   :  { %v5341_v20 = vpop.eup %5340  ;;  %v1408_v21 = vmul.f32 %v5339_v19, %v5323_v49  ;;  %4938 = vmatpush3.msra.mxu1 %v722_v17  ;;  %4934 = vmatprep.mubr.msk.f32.mxu0 %vm5663_vm2, %v5662_v33 }
 0x576   :  { %v1409_v22 = vmul.f32 %v5341_v20, %v5325_v50  ;;  %4939 = vmatprep.mubr.msk.f32.mxu1 %vm5663_vm2, %v5662_v33  ;;  %4942 = vmatprep.subr.mxu0 %v5662_v33 }
 0x577   :  { %4935 = vmatmul.mubr.msk.f32.vlgmr.msra.gmra.mrb[18].mxu0 %vm1322_vm6, %v1408_v21  ;;  %5197 = vmatprep.subr.bf16.mxu1 %v5196_v30 }
 0x578   :  { %v5343_v28 = vpop.eup %5342  ;;  %4940 = vmatmul.mubr.msk.f32.vlgmr.msra.gmra.mrb[18].mxu1 %vm1322_vm6, %v1409_v22  ;;  %4943 = vmatpush3.msra.mxu0 %v723_v23 }
 0x579   :  { %v1410_v25 = vmul.f32 %v5343_v28, %v5327_v53  ;;  %4944 = vmatprep.mubr.msk.f32.mxu0 %vm5663_vm2, %v5662_v33  ;;  %5199 = vmatpush3.bf16.msra.mxu1 %v5196_v30  ;;  %v2152_v30 = vld [vmem:[#allocation17 + $0x18] sm:$0xff] }
 0x57a   :  { %5201 = vmatprep.subr.bf16.mxu1 %v5200_v27  ;;  %v5208_v31 = vpack.c.bf16 %v2152_v30, %v2151_v26  ;;  %v4583_v30 = vld [vmem:[%s6460_s6 + $0x68] sm:$0xff] }
 0x57b   :  { %4945 = vmatmul.mubr.msk.f32.vlgmr.msra.gmra.mrb[20].mxu0 %vm1322_vm6, %v1410_v25  ;;  %v2150_v25 = vld [vmem:[#allocation17 + $0x8] sm:$0xff] }
 0x57d   :  { %5203 = vmatpush3.bf16.msra.mxu1 %v5200_v27  ;;  %v2244_v27 = vld [vmem:[%s6467_s13 + $0x8] sm:$0xff] }
 0x63e   :  { %v1480_v34 = vpop.f32.mrb[12].mxu1 }
 0x63f   :  { %v4911_v35 = vpop.f32.mrb[13].mxu1  ;;  %v1995_v39 = vsel %vm295_vm1, %v1480_v34, 0.0  ;;  %v2245_v34 = vld [vmem:[%s6467_s13 + $0x10] sm:$0xff] }
 0x640   :  { %v5212_v35 = vpack.c.bf16 %v2244_v27, %v2243_v32  ;;  %v4596_v32 = vld [vmem:[%s6460_s6 + $0xa0] sm:$0xff]  ;;  %v4597_v27 = vld [vmem:[%s6460_s6 + $0xa8] sm:$0xff] }
 0x642   :  { %v1553_v36 = vpop.f32.mrb[14].mxu0  ;;  %5213 = vmatprep.subr.bf16.mxu1 %v5212_v35 }
 0x643   :  { %v1626_v37 = vpop.f32.mrb[14].mxu1  ;;  %v4916_v38 = vpop.f32.mrb[15].mxu0  ;;  %v2002_v44 = vsel %vm295_vm1, %v1553_v36, 0.0  ;;  %v2246_v36 = vld [vmem:[%s6467_s13 + $0x18] sm:$0xff] }
 0x644   :  { %v1996_v40 = vsel %vm295_vm1, %v1626_v37, 0.0  ;;  %v4921_v41 = vpop.f32.mrb[15].mxu1  ;;  %v5216_v37 = vpack.c.bf16 %v2246_v36, %v2245_v34  ;;  %v2247_v38 = vld [vmem:[%s6467_s13 + $0x20] sm:$0xff]  ;;  %v4584_v34 = vld [vmem:[%s6460_s6 + $0x70] sm:$0xff]  ;;  %v4585_v36 = vld [vmem:[%s6460_s6 + $0x78] sm:$0xff] }
 0x645   :  { %v1997_v42 = vadd.f32 %v1996_v40, %v1995_v39  ;;  %v2248_v39 = vld [vmem:[%s6467_s13 + $0x28] sm:$0xff] }
 0x646   :  { %v1699_v43 = vpop.f32.mrb[16].mxu0  ;;  %v5220_v40 = vpack.c.bf16 %v2248_v39, %v2247_v38  ;;  %v4599_v38 = vld [vmem:[%s6460_s6 + $0xb8] sm:$0xff]  ;;  %v5232_v39 = vpack.c.bf16 %v4585_v36, %v4584_v34 }
 0x647   :  { %v2003_v47 = vsel %vm295_vm1, %v1699_v43, 0.0  ;;  %v1772_v48 = vpop.f32.mrb[16].mxu1  ;;  %v4926_v49 = vpop.f32.mrb[17].mxu0 }
 0x648   :  { %v2004_v50 = vadd.f32 %v2003_v47, %v2002_v44  ;;  %v1998_v51 = vsel %vm295_vm1, %v1772_v48, 0.0  ;;  %v4931_v52 = vpop.f32.mrb[17].mxu1 }
 0x649   :  { %v1999_v53 = vadd.f32 %v1998_v51, %v1997_v42 }
 0x64a   :  { %v1845_v54 = vpop.f32.mrb[18].mxu0 }
 0x64b   :  { %v2005_v55 = vsel %vm295_vm1, %v1845_v54, 0.0  ;;  %v1918_v58 = vpop.f32.mrb[18].mxu1  ;;  %v4936_v59 = vpop.f32.mrb[19].mxu0  ;;  %v4573_v54 = vld [vmem:[#allocation16 + $0x1] ss:$0 sm:$0xff] }
 0x64c   :  { %v2006_v60 = vadd.f32 %v2005_v55, %v2004_v50  ;;  %v2000_v61 = vsel %vm295_vm1, %v1918_v58, 0.0  ;;  %v4941_v62 = vpop.f32.mrb[19].mxu1  ;;  %v4572_v50 = vld [vmem:[#allocation16] ss:$0 sm:$0xff] }
 0x64d   :  { %v2001_v63 = vadd.f32 %v2000_v61, %v1999_v53  ;;  %v2249_v61 = vld [vmem:[%s6467_s13 + $0x30] sm:$0xff]  ;;  %v2250_v62 = vld [vmem:[%s6467_s13 + $0x38] sm:$0xff] }
 0x64e   :  { %v1991_v0 = vpop.f32.mrb[20].mxu0 }
 0x64f   :  { %v2007_v1 = vsel %vm295_vm1, %v1991_v0, 0.0  ;;  %4955 = vmatprep.mubr.msk.f32.mxu1 %vm295_vm1, %v2001_v63  ;;  %v4946_v2 = vpop.f32.mrb[21].mxu0  ;;  %v5224_v63 = vpack.c.bf16 %v2250_v62, %v2249_v61  ;;  %v4574_v0 = vld [vmem:[%s6466_s12] ss:$0 sm:$0xff]  ;;  %v4591_v62 = vld [vmem:[%s6460_s6 + $0x90] sm:$0xff] }
 0x650   :  { %v2008_v4 = vadd.f32 %v2007_v1, %v2006_v60 }
 0x652   :  { %4956 = vmatmul.mubr.msk.f32.vlgmr.msra.gmra.mrb[20].mxu1 %vm295_vm1, %v2008_v4 }
 0x653   :  { %5215 = vmatpush3.bf16.msra.mxu1 %v5212_v35  ;;  %v5244_v35 = vpack.c.bf16 %v4597_v27, %v4596_v32 }
 0x654   :  { %5217 = vmatprep.subr.bf16.mxu1 %v5216_v37 }
 0x657   :  { %5219 = vmatpush3.bf16.msra.mxu1 %v5216_v37  ;;  %v4598_v37 = vld [vmem:[%s6460_s6 + $0xb0] sm:$0xff] }
 0x658   :  { %5221 = vmatprep.subr.bf16.mxu1 %v5220_v40 }
 0x65b   :  { %5223 = vmatpush3.bf16.msra.mxu1 %v5220_v40  ;;  %v5248_v40 = vpack.c.bf16 %v4599_v38, %v4598_v37 }
 0x65c   :  { %5225 = vmatprep.subr.bf16.mxu1 %v5224_v63 }
 0x65f   :  { %5227 = vmatpush3.bf16.msra.mxu1 %v5224_v63  ;;  %v4592_v63 = vld [vmem:[%s6460_s6 + $0x98] sm:$0xff] }
 0x660   :  { %5245 = vmatprep.subr.bf16.mxu1 %v5244_v35 }
 0x725   :  { %v4957_v6 = vpop.f32.mrb[20].mxu1 }
 0x726   :  { %v2098_v7 = vadd.f32 %v4957_v6, %v4569_v5  ;;  %v2092_v8 = vpop.f32.mrb[21].mxu1 }
 0x727   :  { %v2093_v9 = vadd.f32 %v4569_v5, %v2092_v8  ;;  %v4577_v8 = vld [vmem:[%s6468_s14] ss:$0 sm:$0xff] }
 0x728   :  { %v2102_v10 = vadd.f32 %v2098_v7, %v5974_v46 }
 0x729   :  { %v2101_v11 = vadd.f32 %v2093_v9, %v5972_v45  ;;  %v2149_v45 = vld [vmem:[#allocation17] sm:$0xff] }
 0x72a   :  { %v2109_v12 = vsel %vm295_vm1, %v2102_v10, 0.0  ;;  %v5204_v29 = vpack.c.bf16 %v2150_v25, %v2149_v45 }
 0x72b   :  { %2110 = vadd.xlane.f32.xlu1 %v2109_v12  ;;  %v2106_v13 = vsel %vm295_vm1, %v2101_v11, 0.0 }
 0x72c   :  { %2107 = vadd.xlane.f32.xlu0 %v2106_v13  ;;  %5205 = vmatprep.subr.bf16.mxu0 %v5204_v29 }
 0x72d   :  { %5207 = vmatpush3.bf16.msra.mxu0 %v5204_v29  ;;  %v4582_v29 = vld [vmem:[%s6460_s6 + $0x60] sm:$0xff] }
 0x72e   :  { %5209 = vmatprep.subr.bf16.mxu0 %v5208_v31 }
 0x731   :  { %5211 = vmatpush3.bf16.msra.mxu0 %v5208_v31  ;;  %v5228_v31 = vpack.c.bf16 %v4583_v30, %v4582_v29 }
 0x733   :  { %5229 = vmatprep.subr.bf16.mxu0 %v5228_v31 }
 0x7b8   :  { %v2111_v14 = vpop.xlane.xlu1 %2110 }
 0x7b9   :  { %v2114_v16 = vmul.f32 0.03125, %v2111_v14  ;;  %v2108_v17 = vpop.xlane.xlu0 %2107 }
 0x7ba   :  { %v2113_v19 = vmul.f32 0.03125, %v2108_v17 }
 0x7bb   :  { %v2116_v20 = vsub.f32 %v2102_v10, %v2114_v16 }
 0x7bc   :  { %v2115_v21 = vsub.f32 %v2101_v11, %v2113_v19 }
 0x7bd   :  { %v2118_v22 = vmul.f32 %v2116_v20, %v2116_v20 }
 0x7be   :  { %v2117_v23 = vmul.f32 %v2115_v21, %v2115_v21 }
 0x7bf   :  { %v2122_v28 = vsel %vm295_vm1, %v2118_v22, 0.0 }
 0x7c0   :  { %2123 = vadd.xlane.f32.xlu1 %v2122_v28  ;;  %v2119_v46 = vsel %vm295_vm1, %v2117_v23, 0.0 }
 0x7c1   :  { %2120 = vadd.xlane.f32.xlu0 %v2119_v46 }
 0x84d   :  { %v2124_v41 = vpop.xlane.xlu1 %2123 }
 0x84e   :  { %v2126_v42 = vmul.f32 0.03125, %v2124_v41  ;;  %v2121_v43 = vpop.xlane.xlu0 %2120  ;;  %v4589_v41 = vld [vmem:[%s6460_s6 + $0x80] sm:$0xff] }
 0x84f   :  { %v2125_v44 = vmul.f32 0.03125, %v2121_v43 }
 0x850   :  { %v2128_v47 = vadd.f32 1e-05, %v2126_v42  ;;  %v4590_v42 = vld [vmem:[%s6460_s6 + $0x88] sm:$0xff] }
 0x851   :  { %v2127_v48 = vadd.f32 1e-05, %v2125_v44  ;;  %v5236_v43 = vpack.c.bf16 %v4590_v42, %v4589_v41 }
 0x852   :  { %5344 = vrsqrt.f32 %v2128_v47 }
 0x853   :  { %5346 = vrsqrt.f32 %v2127_v48 }
 0x85c   :  { %v5345_v49 = vpop.eup %5344 }
 0x85d   :  { %v5347_v51 = vpop.eup %5346  ;;  %v2132_v52 = vmul.f32 %v5345_v49, %v2116_v20 }
 0x85e   :  { %v2131_v53 = vmul.f32 %v5347_v51, %v2115_v21 }
 0x85f   :  { %v2140_v55 = vmul.f32 %v4572_v50, %v2132_v52 }
 0x860   :  { %v2139_v58 = vmul.f32 %v4572_v50, %v2131_v53  ;;  %v4580_v53 = vld [vmem:[#allocation16 + $0x2] ss:$0 sm:$0xff] }
 0x861   :  { %v2148_v60 = vadd.f32 %v4573_v54, %v2140_v55 }
 0x862   :  { %v2147_v59 = vadd.f32 %v4573_v54, %v2139_v58 }
 0x864   :  { %4966 = vmatprep.mubr.msk.f32.mxu0 %vm295_vm1, %v2147_v59 }
 0x865   :  { %4967 = vmatmul.mubr.msk.f32.vlgmr.msra.gmra.mrb[22].mxu0 %vm295_vm1, %v2148_v60 }
 0x866   :  { %5231 = vmatpush3.bf16.msra.mxu0 %v5228_v31 }
 0x867   :  { %5233 = vmatprep.subr.bf16.mxu0 %v5232_v39 }
 0x86a   :  { %5235 = vmatpush3.bf16.msra.mxu0 %v5232_v39 }
 0x86b   :  { %5237 = vmatprep.subr.bf16.mxu0 %v5236_v43 }
 0x938   :  { %v4968_v1 = vpop.f32.mrb[22].mxu0 }
 0x939   :  { %v2238_v2 = vadd.f32 %v4968_v1, %v4574_v0  ;;  %v2232_v4 = vpop.f32.mrb[23].mxu0 }
 0x93a   :  { %v2233_v5 = vadd.f32 %v4574_v0, %v2232_v4 }
 0x93b   :  { %v2242_v7 = vmax.f32 %v2238_v2, 0.0  ;;  %v5240_v2 = vpack.c.bf16 %v4592_v63, %v4591_v62 }
 0x93c   :  { %v2241_v6 = vmax.f32 %v2233_v5, 0.0 }
 0x93e   :  { %4985 = vmatprep.mubr.msk.f32.mxu1 %vm2258_vm7, %v2241_v6 }
 0x93f   :  { %4986 = vmatmul.mubr.msk.f32.vlgmr.msra.gmra.mrb[22].mxu1 %vm2258_vm7, %v2242_v7 }
 0x940   :  { %5247 = vmatpush3.bf16.msra.mxu1 %v5244_v35 }
 0x941   :  { %5249 = vmatprep.subr.bf16.mxu1 %v5248_v40 }
 0x944   :  { %5251 = vmatpush3.bf16.msra.mxu1 %v5248_v40 }
 0x945   :  { %5031 = vmatprep.subr.mxu1 %v5662_v33 }
 0xa12   :  { %v4987_v9 = vpop.f32.mrb[22].mxu1 }
 0xa13   :  { %v2337_v10 = vadd.f32 %v4987_v9, %v4577_v8  ;;  %v2331_v11 = vpop.f32.mrb[23].mxu1  ;;  %v4593_v9 = vld [vmem:[#allocation13 + $0x4] ss:$0 sm:$0xff] }
 0xa14   :  { %v2332_v12 = vadd.f32 %v4577_v8, %v2331_v11  ;;  %v4586_v8 = vld [vmem:[#allocation13 + $0x3] ss:$0 sm:$0xff] }
 0xa15   :  { %v2341_v13 = vadd.f32 %v2337_v10, %v2148_v60 }
 0xa16   :  { %v2340_v14 = vadd.f32 %v2332_v12, %v2147_v59  ;;  %v4581_v59 = vld [vmem:[#allocation16 + $0x3] ss:$0 sm:$0xff] }
 0xa17   :  { %v2349_v16 = vsel %vm295_vm1, %v2341_v13, 0.0 }
 0xa18   :  { %2350 = vadd.xlane.f32.xlu1 %v2349_v16  ;;  %v2346_v17 = vsel %vm295_vm1, %v2340_v14, 0.0 }
 0xa19   :  { %2347 = vadd.xlane.f32.xlu0 %v2346_v17 }
 0xaa5   :  { %v2351_v19 = vpop.xlane.xlu1 %2350 }
 0xaa6   :  { %v2353_v20 = vmul.f32 0.03125, %v2351_v19  ;;  %v2348_v21 = vpop.xlane.xlu0 %2347 }
 0xaa7   :  { %v2352_v22 = vmul.f32 0.03125, %v2348_v21 }
 0xaa8   :  { %v2355_v23 = vsub.f32 %v2341_v13, %v2353_v20  ;;  %v4600_v20 = vld [vmem:[#allocation13 + $0x5] ss:$0 sm:$0xff] }
 0xaa9   :  { %v2354_v28 = vsub.f32 %v2340_v14, %v2352_v22 }
 0xaaa   :  { %v2357_v46 = vmul.f32 %v2355_v23, %v2355_v23 }
 0xaab   :  { %v2356_v45 = vmul.f32 %v2354_v28, %v2354_v28 }
 0xaac   :  { %v2361_v25 = vsel %vm295_vm1, %v2357_v46, 0.0 }
 0xaad   :  { %2362 = vadd.xlane.f32.xlu1 %v2361_v25  ;;  %v2358_v26 = vsel %vm295_vm1, %v2356_v45, 0.0 }
 0xaae   :  { %2359 = vadd.xlane.f32.xlu0 %v2358_v26 }
 0xb3a   :  { %v2363_v44 = vpop.xlane.xlu1 %2362 }
 0xb3b   :  { %v2365_v47 = vmul.f32 0.03125, %v2363_v44  ;;  %v2360_v48 = vpop.xlane.xlu0 %2359 }
 0xb3c   :  { %v2364_v49 = vmul.f32 0.03125, %v2360_v48 }
 0xb3d   :  { %v2367_v50 = vadd.f32 1e-05, %v2365_v47 }
 0xb3e   :  { %v2366_v51 = vadd.f32 1e-05, %v2364_v49 }
 0xb3f   :  { %5348 = vrsqrt.f32 %v2367_v50 }
 0xb40   :  { %5350 = vrsqrt.f32 %v2366_v51 }
 0xb49   :  { %v5349_v52 = vpop.eup %5348 }
 0xb4a   :  { %v5351_v54 = vpop.eup %5350  ;;  %v2371_v55 = vmul.f32 %v5349_v52, %v2355_v23 }
 0xb4b   :  { %v2370_v58 = vmul.f32 %v5351_v54, %v2354_v28 }
 0xb4c   :  { %v2379_v60 = vmul.f32 %v4580_v53, %v2371_v55 }
 0xb4d   :  { %v2378_v61 = vmul.f32 %v4580_v53, %v2370_v58 }
 0xb4e   :  { %v6225_v1 = vadd.f32 %v4581_v59, %v2379_v60 }
 0xb4f   :  { %v6223_v0 = vadd.f32 %v4581_v59, %v2378_v61 }
 0xb51   :  { %4996 = vmatprep.mubr.msk.f32.mxu0 %vm295_vm1, %v6223_v0  ;;  %5018 = vmatprep.mubr.msk.f32.mxu1 %vm295_vm1, %v6223_v0 }
 0xb52   :  { %4997 = vmatmul.mubr.msk.f32.vlgmr.msra.gmra.mrb[24].mxu0 %vm295_vm1, %v6225_v1  ;;  %5019 = vmatmul.mubr.msk.f32.vlgmr.msra.gmra.mrb[24].mxu1 %vm295_vm1, %v6225_v1 }
 0xb53   :  { %5239 = vmatpush3.bf16.msra.mxu0 %v5236_v43  ;;  %5007 = vmatprep.mubr.msk.f32.mxu0 %vm295_vm1, %v6223_v0 }
 0xb54   :  { %5241 = vmatprep.subr.bf16.mxu0 %v5240_v2  ;;  %5033 = vmatprep.mubr.msk.f32.mxu1 %vm5663_vm2, %v5662_v33 }
 0xb57   :  { %5243 = vmatpush3.bf16.msra.mxu0 %v5240_v2 }
 0xb58   :  { %5021 = vmatprep.subr.mxu0 %v5662_v33 }
 0xb5a   :  { %5008 = vmatmul.mubr.msk.f32.vlgmr.msra.gmra.mrb[26].mxu0 %vm295_vm1, %v6225_v1 }
 0xb5b   :  { %5023 = vmatprep.mubr.msk.f32.mxu0 %vm5663_vm2, %v5662_v33 }
 0xc25   :  { %v4998_v4 = vpop.f32.mrb[24].mxu0  ;;  %v5020_v5 = vpop.f32.mrb[24].mxu1 }
 0xc26   :  { %v2473_v6 = vpop.f32.mrb[25].mxu0  ;;  %v2649_v7 = vpop.f32.mrb[25].mxu1  ;;  %v2479_v14 = vadd.f32 %v4998_v4, %v4586_v8  ;;  %v6285_v26 = vadd.f32 %v5020_v5, %v4600_v20 }
 0xc27   :  { %v2474_v11 = vadd.f32 %v4586_v8, %v2473_v6  ;;  %v6260_v23 = vadd.f32 %v4600_v20, %v2649_v7 }
 0xc28   :  { %v2659_v21 = vmul.f32 %v2479_v14, %v6011_v3  ;;  %v2661_v28 = vmul.f32 %v2479_v14, %v6015_v15  ;;  %v2663_v25 = vmul.f32 %v2479_v14, %v6024_v18  ;;  %v2665_v29 = vmul.f32 %v2479_v14, %v6038_v24 }
 0xc29   :  { %v2658_v16 = vmul.f32 %v2474_v11, %v6011_v3  ;;  %v2660_v17 = vmul.f32 %v2474_v11, %v6015_v15  ;;  %v2662_v22 = vmul.f32 %v2474_v11, %v6024_v18  ;;  %v2664_v46 = vmul.f32 %v2474_v11, %v6038_v24 }
 0xc2a   :  { %v2666_v45 = vmul.f32 %v6260_v23, %v6011_v3  ;;  %v2667_v30 = vmul.f32 %v6285_v26, %v6011_v3 }
 0xc2d   :  { %v5009_v10 = vpop.f32.mrb[26].mxu0 }
 0xc2e   :  { %v2561_v12 = vpop.f32.mrb[27].mxu0  ;;  %v2567_v19 = vadd.f32 %v5009_v10, %v4593_v9 }
 0xc2f   :  { %v2562_v13 = vadd.f32 %v4593_v9, %v2561_v12 }
 0xc31   :  { %5022 = vmatpush3.xpose.msk.msra.mxu0 %vm295_vm1, %v2562_v13  ;;  %5032 = vmatpush3.xpose.msk.msra.mxu1 %vm295_vm1, %v2562_v13 }
 0xc32   :  { %5026 = vmatprep.subr.mxu0 %v5662_v33  ;;  %5041 = vmatprep.subr.mxu1 %v5662_v33 }
 0xc34   :  { %5024 = vmatmul.mubr.msk.f32.vlgmr.msra.gmra.mrb[28].mxu0 %vm295_vm1, %v2658_v16  ;;  %5034 = vmatmul.mubr.msk.f32.vlgmr.msra.gmra.mrb[26].mxu1 %vm295_vm1, %v2660_v17 }
 0xc35   :  { %5027 = vmatpush3.xpose.msk.msra.mxu0 %vm295_vm1, %v2567_v19  ;;  %5042 = vmatpush3.xpose.msk.msra.mxu1 %vm295_vm1, %v2562_v13 }
 0xc36   :  { %5028 = vmatprep.mubr.msk.f32.mxu0 %vm5663_vm2, %v5662_v33  ;;  %5043 = vmatprep.mubr.msk.f32.mxu1 %vm5663_vm2, %v5662_v33 }
 0xc37   :  { %5036 = vmatprep.subr.mxu0 %v5662_v33  ;;  %5051 = vmatprep.subr.mxu1 %v5662_v33 }
 0xc38   :  { %5029 = vmatmul.mubr.msk.f32.vlgmr.msra.gmra.mrb[30].mxu0 %vm295_vm1, %v2659_v21  ;;  %5044 = vmatmul.mubr.msk.f32.vlgmr.msra.gmra.mrb[28].mxu1 %vm295_vm1, %v2662_v22 }
 0xc39   :  { %5037 = vmatpush3.xpose.msk.msra.mxu0 %vm295_vm1, %v2567_v19  ;;  %5052 = vmatpush3.xpose.msk.msra.mxu1 %vm295_vm1, %v2562_v13 }
 0xc3a   :  { %5038 = vmatprep.mubr.msk.f32.mxu0 %vm5663_vm2, %v5662_v33  ;;  %5053 = vmatprep.mubr.msk.f32.mxu1 %vm5663_vm2, %v5662_v33 }
 0xc3b   :  { %5046 = vmatprep.subr.mxu0 %v5662_v33  ;;  %5061 = vmatprep.subr.mxu1 %v5662_v33 }
 0xc3c   :  { %5039 = vmatmul.mubr.msk.f32.vlgmr.msra.gmra.mrb[32].mxu0 %vm295_vm1, %v2661_v28  ;;  %5054 = vmatmul.mubr.msk.f32.vlgmr.msra.gmra.mrb[30].mxu1 %vm295_vm1, %v2664_v46 }
 0xc3d   :  { %5047 = vmatpush3.xpose.msk.msra.mxu0 %vm295_vm1, %v2567_v19  ;;  %5062 = vmatpush3.msra.mxu1 %v2666_v45 }
 0xc3e   :  { %5048 = vmatprep.mubr.msk.f32.mxu0 %vm5663_vm2, %v5662_v33  ;;  %5056 = vmatprep.subr.mxu0 %v5662_v33 }
 0xc3f   :  { %5063 = vmatprep.mubr.msk.f32.mxu1 %vm5663_vm2, %v5662_v33  ;;  %5071 = vmatprep.subr.mxu1 %v5662_v33 }
 0xc40   :  { %5049 = vmatmul.mubr.msk.f32.vlgmr.msra.gmra.mrb[34].mxu0 %vm295_vm1, %v2663_v25 }
 0xc41   :  { %5057 = vmatpush3.xpose.msk.msra.mxu0 %vm295_vm1, %v2567_v19  ;;  %5058 = vmatprep.mubr.msk.f32.mxu0 %vm5663_vm2, %v5662_v33 }
 0xc42   :  { %5066 = vmatprep.subr.mxu0 %v5662_v33 }
 0xc44   :  { %5059 = vmatmul.mubr.msk.f32.vlgmr.msra.gmra.mrb[36].mxu0 %vm295_vm1, %v2665_v29 }
 0xc45   :  { %5067 = vmatpush3.msra.mxu0 %v2667_v30  ;;  %5068 = vmatprep.mubr.msk.f32.mxu0 %vm5663_vm2, %v5662_v33 }
 0xc46   :  { %5076 = vmatprep.subr.mxu0 %v5662_v33 }
 0xd07   :  { %v2746_v31 = vpop.f32.mrb[28].mxu0  ;;  %v2895_v32 = vpop.f32.mrb[26].mxu1 }
 0xd08   :  { %v3264_v27 = vmul.f32 0.35355338, %v2746_v31  ;;  %v5025_v34 = vpop.f32.mrb[29].mxu0  ;;  %v5035_v35 = vpop.f32.mrb[27].mxu1  ;;  %v3266_v36 = vmul.f32 0.35355338, %v2895_v32 }
 0xd0a   :  { %v3272_v37 = vsel %vm1322_vm6, %v3264_v27, -inf  ;;  %v3278_v43 = vsel %vm1322_vm6, %v3266_v36, -inf }
 0xd0b   :  { %v3041_v38 = vpop.f32.mrb[28].mxu1  ;;  %3273 = vmax.xlane.f32.xlu0 %v3272_v37  ;;  %v2822_v39 = vpop.f32.mrb[30].mxu0 }
 0xd0c   :  { %v3265_v3 = vmul.f32 0.35355338, %v2822_v39  ;;  %v5030_v40 = vpop.f32.mrb[31].mxu0  ;;  %v5045_v41 = vpop.f32.mrb[29].mxu1  ;;  %v3268_v42 = vmul.f32 0.35355338, %v3041_v38 }
 0xd0e   :  { %v3275_v44 = vsel %vm1322_vm6, %v3265_v3, -inf  ;;  %v3284_v53 = vsel %vm1322_vm6, %v3268_v42, -inf }
 0xd0f   :  { %v3187_v47 = vpop.f32.mrb[30].mxu1  ;;  %3279 = vmax.xlane.f32.xlu0 %v3278_v43  ;;  %3276 = vmax.xlane.f32.xlu1 %v3275_v44  ;;  %v2968_v48 = vpop.f32.mrb[32].mxu0 }
 0xd10   :  { %v3267_v49 = vmul.f32 0.35355338, %v2968_v48  ;;  %v5040_v50 = vpop.f32.mrb[33].mxu0  ;;  %v5055_v51 = vpop.f32.mrb[31].mxu1  ;;  %v3270_v52 = vmul.f32 0.35355338, %v3187_v47 }
 0xd12   :  { %v3281_v54 = vsel %vm1322_vm6, %v3267_v49, -inf  ;;  %v3290_v60 = vsel %vm1322_vm6, %v3270_v52, -inf }
 0xd13   :  { %3285 = vmax.xlane.f32.xlu0 %v3284_v53  ;;  %3282 = vmax.xlane.f32.xlu1 %v3281_v54  ;;  %v3114_v55 = vpop.f32.mrb[34].mxu0 }
 0xd14   :  { %v3269_v58 = vmul.f32 0.35355338, %v3114_v55  ;;  %v5050_v59 = vpop.f32.mrb[35].mxu0 }
 0xd16   :  { %v3287_v61 = vsel %vm1322_vm6, %v3269_v58, -inf }
 0xd17   :  { %3291 = vmax.xlane.f32.xlu0 %v3290_v60  ;;  %3288 = vmax.xlane.f32.xlu1 %v3287_v61  ;;  %v3260_v62 = vpop.f32.mrb[36].mxu0  ;;  %v2668_v61 = vmul.f32 %v6260_v23, %v6015_v15 }
 0xd18   :  { %v3271_v63 = vmul.f32 0.35355338, %v3260_v62  ;;  %v5060_v2 = vpop.f32.mrb[37].mxu0 }
 0xd1a   :  { %v3293_v4 = vsel %vm1322_vm6, %v3271_v63, -inf }
 0xd1b   :  { %3294 = vmax.xlane.f32.xlu1 %v3293_v4 }
 0xd98   :  { %v3274_v5 = vpop.xlane.xlu0 %3273 }
 0xd99   :  { %v3296_v6 = vsub.f32 %v3264_v27, %v3274_v5 }
 0xd9b   :  { %v3304_v7 = vmul.f32 1.442695, %v3296_v6  ;;  %v2670_v6 = vmul.f32 %v6260_v23, %v6024_v18 }
 0xd9c   :  { %v3280_v8 = vpop.xlane.xlu0 %3279  ;;  %v3277_v9 = vpop.xlane.xlu1 %3276 }
 0xd9d   :  { %5352 = vpow2.f32 %v3304_v7  ;;  %v3298_v10 = vsub.f32 %v3266_v36, %v3280_v8  ;;  %v3297_v11 = vsub.f32 %v3265_v3, %v3277_v9  ;;  %v2669_v7 = vmul.f32 %v6285_v26, %v6015_v15 }
 0xd9e   :  { %v2671_v15 = vmul.f32 %v6285_v26, %v6024_v18  ;;  %v2673_v18 = vmul.f32 %v6285_v26, %v6038_v24 }
 0xd9f   :  { %v3308_v12 = vmul.f32 1.442695, %v3298_v10  ;;  %v3306_v13 = vmul.f32 1.442695, %v3297_v11 }
 0xda0   :  { %v3286_v14 = vpop.xlane.xlu0 %3285  ;;  %v3283_v16 = vpop.xlane.xlu1 %3282 }
 0xda1   :  { %5354 = vpow2.f32 %v3308_v12  ;;  %v3300_v17 = vsub.f32 %v3268_v42, %v3286_v14  ;;  %v3299_v19 = vsub.f32 %v3267_v49, %v3283_v16  ;;  %v2672_v12 = vmul.f32 %v6260_v23, %v6038_v24 }
 0xda2   :  { %5356 = vpow2.f32 %v3306_v13 }
 0xda3   :  { %v3312_v20 = vmul.f32 1.442695, %v3300_v17  ;;  %v3310_v21 = vmul.f32 1.442695, %v3299_v19 }
 0xda4   :  { %v3292_v22 = vpop.xlane.xlu0 %3291  ;;  %v3289_v28 = vpop.xlane.xlu1 %3288 }
 0xda5   :  { %5358 = vpow2.f32 %v3312_v20  ;;  %v3302_v46 = vsub.f32 %v3270_v52, %v3292_v22  ;;  %v3301_v45 = vsub.f32 %v3269_v58, %v3289_v28  ;;  %v3959_v20 = vld [vmem:[#allocation14 + $0x20] sm:$0xff]  ;;  %v3961_v28 = vld [vmem:[#allocation14 + $0x30] sm:$0xff] }
 0xda6   :  { %5360 = vpow2.f32 %v3310_v21  ;;  %v3960_v21 = vld [vmem:[#allocation14 + $0x28] sm:$0xff] }
 0xda7   :  { %v5353_v25 = vpop.eup %5352  ;;  %v3316_v29 = vmul.f32 1.442695, %v3302_v46  ;;  %v3314_v30 = vmul.f32 1.442695, %v3301_v45  ;;  %v5252_v22 = vpack.c.bf16 %v3960_v21, %v3959_v20  ;;  %v3962_v46 = vld [vmem:[#allocation14 + $0x38] sm:$0xff]  ;;  %v4637_v20 = vld [vmem:[%s6467_s13 + $0x40] sm:$0xff] }
 0xda8   :  { %v3295_v31 = vpop.xlane.xlu1 %3294  ;;  %v3320_v32 = vsel %vm1322_vm6, %v5353_v25, 0.0  ;;  %v5256_v45 = vpack.c.bf16 %v3962_v46, %v3961_v28  ;;  %v4638_v21 = vld [vmem:[%s6467_s13 + $0x48] sm:$0xff]  ;;  %v4640_v46 = vld [vmem:[%s6467_s13 + $0x58] sm:$0xff] }
 0xda9   :  { %5362 = vpow2.f32 %v3316_v29  ;;  %v3303_v27 = vsub.f32 %v3271_v63, %v3295_v31  ;;  %3321 = vadd.xlane.f32.xlu0 %v3320_v32  ;;  %v5268_v28 = vpack.c.bf16 %v4638_v21, %v4637_v20  ;;  %v4649_v21 = vld [vmem:[#allocation16 + $0x6] ss:$0 sm:$0xff] }
 0xdaa   :  { %5364 = vpow2.f32 %v3314_v30 }
 0xdab   :  { %v5355_v34 = vpop.eup %5354  ;;  %v3318_v35 = vmul.f32 1.442695, %v3303_v27 }
 0xdac   :  { %v5357_v36 = vpop.eup %5356  ;;  %v3326_v37 = vsel %vm1322_vm6, %v5355_v34, 0.0 }
 0xdad   :  { %5366 = vpow2.f32 %v3318_v35  ;;  %3327 = vadd.xlane.f32.xlu0 %v3326_v37  ;;  %v3323_v38 = vsel %vm1322_vm6, %v5357_v36, 0.0 }
 0xdae   :  { %3324 = vadd.xlane.f32.xlu1 %v3323_v38 }
 0xdaf   :  { %v5359_v39 = vpop.eup %5358 }
 0xdb0   :  { %v5361_v3 = vpop.eup %5360  ;;  %v3332_v40 = vsel %vm1322_vm6, %v5359_v39, 0.0 }
 0xdb1   :  { %3333 = vadd.xlane.f32.xlu0 %v3332_v40  ;;  %v3329_v41 = vsel %vm1322_vm6, %v5361_v3, 0.0 }
 0xdb2   :  { %3330 = vadd.xlane.f32.xlu1 %v3329_v41 }
 0xdb3   :  { %v5363_v42 = vpop.eup %5362 }
 0xdb4   :  { %v5365_v43 = vpop.eup %5364  ;;  %v3338_v44 = vsel %vm1322_vm6, %v5363_v42, 0.0 }
 0xdb5   :  { %3339 = vadd.xlane.f32.xlu0 %v3338_v44  ;;  %v3335_v47 = vsel %vm1322_vm6, %v5365_v43, 0.0 }
 0xdb6   :  { %3336 = vadd.xlane.f32.xlu1 %v3335_v47 }
 0xdb7   :  { %v6317_v48 = vpop.eup %5366 }
 0xdb8   :  { %v3341_v49 = vsel %vm1322_vm6, %v6317_v48, 0.0 }
 0xdba   :  { %3342 = vadd.xlane.f32.xlu1 %v3341_v49 }
 0xe36   :  { %v3322_v50 = vpop.xlane.xlu0 %3321 }
 0xe37   :  { %5368 = vrcp.f32 %v3322_v50 }
 0xe3a   :  { %v3328_v51 = vpop.xlane.xlu0 %3327 }
 0xe3b   :  { %5370 = vrcp.f32 %v3328_v51  ;;  %v3325_v52 = vpop.xlane.xlu1 %3324 }
 0xe3c   :  { %5372 = vrcp.f32 %v3325_v52 }
 0xe3e   :  { %v3334_v53 = vpop.xlane.xlu0 %3333 }
 0xe3f   :  { %5374 = vrcp.f32 %v3334_v53  ;;  %v3331_v54 = vpop.xlane.xlu1 %3330 }
 0xe40   :  { %5376 = vrcp.f32 %v3331_v54 }
 0xe41   :  { %v5369_v55 = vpop.eup %5368 }
 0xe42   :  { %v3352_v58 = vmul.f32 %v5369_v55, %v5353_v25  ;;  %v3340_v59 = vpop.xlane.xlu0 %3339 }
 0xe43   :  { %5378 = vrcp.f32 %v3340_v59  ;;  %v3337_v60 = vpop.xlane.xlu1 %3336  ;;  %v4628_v59 = vld [vmem:[%s6463_s9 + $0x1] ss:$0 sm:$0xff] }
 0xe44   :  { %5380 = vrcp.f32 %v3337_v60  ;;  %5064 = vmatmul.mubr.msk.f32.vlgmr.msra.gmra.mrb[32].mxu1 %vm1322_vm6, %v3352_v58 }
 0xe45   :  { %v5371_v62 = vpop.eup %5370  ;;  %5072 = vmatpush3.msra.mxu1 %v2668_v61  ;;  %5073 = vmatprep.mubr.msk.f32.mxu1 %vm5663_vm2, %v5662_v33 }
 0xe46   :  { %v5373_v63 = vpop.eup %5372  ;;  %v3354_v2 = vmul.f32 %v5371_v62, %v5355_v34  ;;  %5081 = vmatprep.subr.mxu1 %v5662_v33 }
 0xe47   :  { %v3353_v4 = vmul.f32 %v5373_v63, %v5357_v36  ;;  %v3343_v5 = vpop.xlane.xlu1 %3342 }
 0xe48   :  { %5382 = vrcp.f32 %v3343_v5  ;;  %5074 = vmatmul.mubr.msk.f32.vlgmr.msra.gmra.mrb[34].mxu1 %vm1322_vm6, %v3354_v2 }
 0xe49   :  { %v5375_v8 = vpop.eup %5374  ;;  %5069 = vmatmul.mubr.msk.f32.vlgmr.msra.gmra.mrb[38].mxu0 %vm1322_vm6, %v3353_v4  ;;  %5082 = vmatpush3.msra.mxu1 %v2670_v6 }
 0xe4a   :  { %v5377_v9 = vpop.eup %5376  ;;  %v3356_v10 = vmul.f32 %v5375_v8, %v5359_v39  ;;  %5077 = vmatpush3.msra.mxu0 %v2669_v7  ;;  %5078 = vmatprep.mubr.msk.f32.mxu0 %vm5663_vm2, %v5662_v33 }
 0xe4b   :  { %v3355_v11 = vmul.f32 %v5377_v9, %v5361_v3  ;;  %5083 = vmatprep.mubr.msk.f32.mxu1 %vm5663_vm2, %v5662_v33  ;;  %5086 = vmatprep.subr.mxu0 %v5662_v33 }
 0xe4c   :  { %5091 = vmatprep.subr.mxu1 %v5662_v33  ;;  %5084 = vmatmul.mubr.msk.f32.vlgmr.msra.gmra.mrb[36].mxu1 %vm1322_vm6, %v3356_v10 }
 0xe4d   :  { %v5379_v13 = vpop.eup %5378  ;;  %5079 = vmatmul.mubr.msk.f32.vlgmr.msra.gmra.mrb[40].mxu0 %vm1322_vm6, %v3355_v11  ;;  %5092 = vmatpush3.msra.mxu1 %v2672_v12 }
 0xe4e   :  { %v5381_v14 = vpop.eup %5380  ;;  %v3358_v16 = vmul.f32 %v5379_v13, %v5363_v42  ;;  %5087 = vmatpush3.msra.mxu0 %v2671_v15  ;;  %5088 = vmatprep.mubr.msk.f32.mxu0 %vm5663_vm2, %v5662_v33 }
 0xe4f   :  { %v3357_v17 = vmul.f32 %v5381_v14, %v5365_v43  ;;  %5093 = vmatprep.mubr.msk.f32.mxu1 %vm5663_vm2, %v5662_v33  ;;  %5096 = vmatprep.subr.mxu0 %v5662_v33 }
 0xe50   :  { %5094 = vmatmul.mubr.msk.f32.vlgmr.msra.gmra.mrb[38].mxu1 %vm1322_vm6, %v3358_v16  ;;  %5253 = vmatprep.subr.bf16.mxu1 %v5252_v22  ;;  %v4102_v16 = vld [vmem:[#allocation17 + $0x28] sm:$0xff] }
 0xe51   :  { %5089 = vmatmul.mubr.msk.f32.vlgmr.msra.gmra.mrb[42].mxu0 %vm1322_vm6, %v3357_v17  ;;  %5255 = vmatpush3.bf16.msra.mxu1 %v5252_v22  ;;  %v4639_v22 = vld [vmem:[%s6467_s13 + $0x50] sm:$0xff] }
 0xe52   :  { %v5383_v23 = vpop.eup %5382  ;;  %5097 = vmatpush3.msra.mxu0 %v2673_v18  ;;  %5098 = vmatprep.mubr.msk.f32.mxu0 %vm5663_vm2, %v5662_v33  ;;  %v4103_v18 = vld [vmem:[#allocation17 + $0x30] sm:$0xff] }
 0xe53   :  { %v3359_v19 = vmul.f32 %v5383_v23, %v6317_v48  ;;  %5257 = vmatprep.subr.bf16.mxu1 %v5256_v45  ;;  %v4104_v23 = vld [vmem:[#allocation17 + $0x38] sm:$0xff] }
 0xe55   :  { %5099 = vmatmul.mubr.msk.f32.vlgmr.msra.gmra.mrb[44].mxu0 %vm1322_vm6, %v3359_v19  ;;  %5259 = vmatpush3.bf16.msra.mxu1 %v5256_v45  ;;  %v5264_v19 = vpack.c.bf16 %v4104_v23, %v4103_v18  ;;  %v5272_v45 = vpack.c.bf16 %v4640_v46, %v4639_v22 }
 0xe56   :  { %5269 = vmatprep.subr.bf16.mxu1 %v5268_v28 }
 0xf17   :  { %v3429_v24 = vpop.f32.mrb[32].mxu1 }
 0xf18   :  { %v5065_v26 = vpop.f32.mrb[33].mxu1  ;;  %v3944_v29 = vsel %vm295_vm1, %v3429_v24, 0.0  ;;  %v4641_v24 = vld [vmem:[%s6467_s13 + $0x60] sm:$0xff] }
 0xf19   :  { %v4642_v26 = vld [vmem:[%s6467_s13 + $0x68] sm:$0xff] }
 0xf1b   :  { %v3575_v25 = vpop.f32.mrb[34].mxu1 }
 0xf1c   :  { %v3502_v30 = vpop.f32.mrb[38].mxu0  ;;  %v3945_v31 = vsel %vm295_vm1, %v3575_v25, 0.0  ;;  %v5075_v32 = vpop.f32.mrb[35].mxu1  ;;  %v5276_v25 = vpack.c.bf16 %v4642_v26, %v4641_v24 }
 0xf1d   :  { %v3946_v27 = vadd.f32 %v3945_v31, %v3944_v29  ;;  %v5070_v34 = vpop.f32.mrb[39].mxu0  ;;  %v3951_v39 = vsel %vm295_vm1, %v3502_v30, 0.0 }
 0xf1f   :  { %v3721_v35 = vpop.f32.mrb[36].mxu1 }
 0xf20   :  { %v3648_v36 = vpop.f32.mrb[40].mxu0  ;;  %v3947_v37 = vsel %vm295_vm1, %v3721_v35, 0.0  ;;  %v5085_v38 = vpop.f32.mrb[37].mxu1 }
 0xf21   :  { %v3952_v3 = vsel %vm295_vm1, %v3648_v36, 0.0  ;;  %v3948_v40 = vadd.f32 %v3947_v37, %v3946_v27  ;;  %v5080_v41 = vpop.f32.mrb[41].mxu0  ;;  %v4631_v36 = vld [vmem:[#allocation16 + $0x4] ss:$0 sm:$0xff] }
 0xf22   :  { %v3953_v42 = vadd.f32 %v3952_v3, %v3951_v39  ;;  %v4632_v3 = vld [vmem:[#allocation16 + $0x5] ss:$0 sm:$0xff] }
 0xf23   :  { %v3867_v43 = vpop.f32.mrb[38].mxu1 }
 0xf24   :  { %v3794_v44 = vpop.f32.mrb[42].mxu0  ;;  %v3949_v47 = vsel %vm295_vm1, %v3867_v43, 0.0  ;;  %v5095_v48 = vpop.f32.mrb[39].mxu1 }
 0xf25   :  { %v3954_v49 = vsel %vm295_vm1, %v3794_v44, 0.0  ;;  %v3950_v50 = vadd.f32 %v3949_v47, %v3948_v40  ;;  %v5090_v51 = vpop.f32.mrb[43].mxu0  ;;  %v4643_v44 = vld [vmem:[%s6467_s13 + $0x70] sm:$0xff]  ;;  %v4644_v47 = vld [vmem:[%s6467_s13 + $0x78] sm:$0xff] }
 0xf26   :  { %v3955_v52 = vadd.f32 %v3954_v49, %v3953_v42  ;;  %v5280_v48 = vpack.c.bf16 %v4644_v47, %v4643_v44  ;;  %v4634_v49 = vld [vmem:[%s6466_s12 + $0x1] ss:$0 sm:$0xff] }
 0xf27   :  { %5109 = vmatprep.mubr.msk.f32.mxu1 %vm295_vm1, %v3950_v50 }
 0xf28   :  { %v3940_v53 = vpop.f32.mrb[44].mxu0 }
 0xf29   :  { %v3956_v54 = vsel %vm295_vm1, %v3940_v53, 0.0  ;;  %v5100_v55 = vpop.f32.mrb[45].mxu0 }
 0xf2a   :  { %v3957_v58 = vadd.f32 %v3956_v54, %v3955_v52 }
 0xf2c   :  { %5110 = vmatmul.mubr.msk.f32.vlgmr.msra.gmra.mrb[40].mxu1 %vm295_vm1, %v3957_v58  ;;  %v4646_v58 = vld [vmem:[%s6468_s14 + $0x1] ss:$0 sm:$0xff] }
 0xf2d   :  { %5271 = vmatpush3.bf16.msra.mxu1 %v5268_v28 }
 0xf2e   :  { %5273 = vmatprep.subr.bf16.mxu1 %v5272_v45 }
 0xf31   :  { %5275 = vmatpush3.bf16.msra.mxu1 %v5272_v45  ;;  %v4650_v45 = vld [vmem:[#allocation16 + $0x7] ss:$0 sm:$0xff] }
 0xf32   :  { %5277 = vmatprep.subr.bf16.mxu1 %v5276_v25 }
 0xf35   :  { %5279 = vmatpush3.bf16.msra.mxu1 %v5276_v25 }
 0xf36   :  { %5281 = vmatprep.subr.bf16.mxu1 %v5280_v48 }
 0xf39   :  { %5283 = vmatpush3.bf16.msra.mxu1 %v5280_v48 }
 0xfff   :  { %v5111_v60 = vpop.f32.mrb[40].mxu1 }
0x1000   :  { %v4049_v61 = vadd.f32 %v5111_v60, %v4628_v59  ;;  %v4043_v62 = vpop.f32.mrb[41].mxu1 }
0x1001   :  { %v4044_v63 = vadd.f32 %v4628_v59, %v4043_v62 }
0x1002   :  { %v4053_v2 = vadd.f32 %v4049_v61, %v6225_v1 }
0x1003   :  { %v4052_v4 = vadd.f32 %v4044_v63, %v6223_v0  ;;  %v4101_v0 = vld [vmem:[#allocation17 + $0x20] sm:$0xff] }
0x1004   :  { %v4061_v5 = vsel %vm295_vm1, %v4053_v2, 0.0  ;;  %v5260_v17 = vpack.c.bf16 %v4102_v16, %v4101_v0 }
0x1005   :  { %4062 = vadd.xlane.f32.xlu1 %v4061_v5  ;;  %v4058_v6 = vsel %vm295_vm1, %v4052_v4, 0.0 }
0x1006   :  { %4059 = vadd.xlane.f32.xlu0 %v4058_v6  ;;  %5261 = vmatprep.subr.bf16.mxu0 %v5260_v17 }
0x1007   :  { %5263 = vmatpush3.bf16.msra.mxu0 %v5260_v17 }
0x1008   :  { %5265 = vmatprep.subr.bf16.mxu0 %v5264_v19 }
0x100b   :  { %5267 = vmatpush3.bf16.msra.mxu0 %v5264_v19 }
0x1092   :  { %v4063_v7 = vpop.xlane.xlu1 %4062 }
0x1093   :  { %v4065_v8 = vmul.f32 0.03125, %v4063_v7  ;;  %v4060_v9 = vpop.xlane.xlu0 %4059 }
0x1094   :  { %v4064_v10 = vmul.f32 0.03125, %v4060_v9 }
0x1095   :  { %v4067_v11 = vsub.f32 %v4053_v2, %v4065_v8 }
0x1096   :  { %v4066_v12 = vsub.f32 %v4052_v4, %v4064_v10 }
0x1097   :  { %v4069_v15 = vmul.f32 %v4067_v11, %v4067_v11 }
0x1098   :  { %v4068_v13 = vmul.f32 %v4066_v12, %v4066_v12 }
0x1099   :  { %v4073_v14 = vsel %vm295_vm1, %v4069_v15, 0.0 }
0x109a   :  { %4074 = vadd.xlane.f32.xlu1 %v4073_v14  ;;  %v4070_v1 = vsel %vm295_vm1, %v4068_v13, 0.0 }
0x109b   :  { %4071 = vadd.xlane.f32.xlu0 %v4070_v1  ;;  %v5665_v1 = vmov 0.0|0.0  }
0x109c   :  { %5284 = vmatprep.subr.bf16.mxu0 %v5665_v1 }
0x1127   :  { %v4075_v29 = vpop.xlane.xlu1 %4074 }
0x1128   :  { %v4077_v30 = vmul.f32 0.03125, %v4075_v29  ;;  %v4072_v31 = vpop.xlane.xlu0 %4071 }
0x1129   :  { %v4076_v32 = vmul.f32 0.03125, %v4072_v31  ;;  %v4417_v31 = vld [vmem:[%s6469_s15 + $0x8] sm:$0xff] }
0x112a   :  { %v4079_v27 = vadd.f32 1e-05, %v4077_v30  ;;  %v4416_v30 = vld [vmem:[%s6469_s15] sm:$0xff] }
0x112b   :  { %v4078_v34 = vadd.f32 1e-05, %v4076_v32 }
0x112c   :  { %5384 = vrsqrt.f32 %v4079_v27  ;;  %v4342_v27 = vsel %vm392_vm5, 0.125, %v5662_v33 }
0x112d   :  { %5386 = vrsqrt.f32 %v4078_v34  ;;  %v5288_v34 = vpack.c.bf16 %v4417_v31, %v4416_v30 }
0x1136   :  { %v5385_v35 = vpop.eup %5384 }
0x1137   :  { %v5387_v37 = vpop.eup %5386  ;;  %v4083_v38 = vmul.f32 %v5385_v35, %v4067_v11  ;;  %v4418_v35 = vld [vmem:[%s6469_s15 + $0x10] sm:$0xff] }
0x1138   :  { %v4082_v39 = vmul.f32 %v5387_v37, %v4066_v12 }
0x1139   :  { %v4091_v40 = vmul.f32 %v4631_v36, %v4083_v38  ;;  %v4652_v38 = vld [vmem:[%s6470_s16] ss:$0 sm:$0xff] }
0x113a   :  { %v4090_v41 = vmul.f32 %v4631_v36, %v4082_v39  ;;  %v4419_v36 = vld [vmem:[%s6469_s15 + $0x18] sm:$0xff]  ;;  %s5612_s15 = scalar_lea.vmem %s4508_s22, 32 }
0x113b   :  { %v4099_v43 = vadd.f32 %v4632_v3, %v4091_v40  ;;  %v5291_v37 = vpack.c.bf16 %v4419_v36, %v4418_v35  ;;  %p5613_p10 = scmp.ne.s32.totalorder %s4508_s22, %s5612_s15  ;;  %p5618_p12 = scmp.lt.s32.totalorder %s5612_s15, %s5612_s15 }
0x113c   :  { %v4098_v42 = vadd.f32 %v4632_v3, %v4090_v41 }
0x113d   :  { %p5619_p13 = por %p5618_p12, %p5617_p11 }
0x113e   :  { %5120 = vmatprep.mubr.msk.f32.mxu0 %vm295_vm1, %v4098_v42 }
0x113f   :  { %5121 = vmatmul.mubr.msk.f32.vlgmr.msra.gmra.mrb[46].mxu0 %vm295_vm1, %v4099_v43  ;;  %p5620_p0 = pnand %p5619_p13, %p5613_p10 }
0x1140   :  { %5146 = vmatprep.mubr.msk.f32.mxu0 %vm5663_vm2, %v5662_v33 }
0x1212   :  { %v5122_v50 = vpop.f32.mrb[46].mxu0 }
0x1213   :  { %v4191_v51 = vadd.f32 %v5122_v50, %v4634_v49  ;;  %v4185_v52 = vpop.f32.mrb[47].mxu0 }
0x1214   :  { %v4186_v53 = vadd.f32 %v4634_v49, %v4185_v52 }
0x1215   :  { %v4195_v55 = vmax.f32 %v4191_v51, 0.0 }
0x1216   :  { %v4194_v54 = vmax.f32 %v4186_v53, 0.0 }
0x1218   :  { %5139 = vmatprep.mubr.msk.f32.mxu1 %vm2258_vm7, %v4194_v54 }
0x1219   :  { %5140 = vmatmul.mubr.msk.f32.vlgmr.msra.gmra.mrb[42].mxu1 %vm2258_vm7, %v4195_v55 }
0x12ec   :  { %v5141_v59 = vpop.f32.mrb[42].mxu1 }
0x12ed   :  { %v4291_v60 = vadd.f32 %v5141_v59, %v4646_v58  ;;  %v4285_v61 = vpop.f32.mrb[43].mxu1 }
0x12ee   :  { %v4286_v62 = vadd.f32 %v4646_v58, %v4285_v61 }
0x12ef   :  { %v4295_v63 = vadd.f32 %v4291_v60, %v4099_v43 }
0x12f0   :  { %v4294_v2 = vadd.f32 %v4286_v62, %v4098_v42 }
0x12f1   :  { %v4303_v4 = vsel %vm295_vm1, %v4295_v63, 0.0 }
0x12f2   :  { %4304 = vadd.xlane.f32.xlu1 %v4303_v4  ;;  %v4300_v5 = vsel %vm295_vm1, %v4294_v2, 0.0 }
0x12f3   :  { %4301 = vadd.xlane.f32.xlu0 %v4300_v5 }
0x137f   :  { %v4305_v6 = vpop.xlane.xlu1 %4304 }
0x1380   :  { %v4307_v7 = vmul.f32 0.03125, %v4305_v6  ;;  %v4302_v8 = vpop.xlane.xlu0 %4301 }
0x1381   :  { %v4306_v9 = vmul.f32 0.03125, %v4302_v8 }
0x1382   :  { %v4309_v10 = vsub.f32 %v4295_v63, %v4307_v7 }
0x1383   :  { %v4308_v11 = vsub.f32 %v4294_v2, %v4306_v9 }
0x1384   :  { %v4311_v12 = vmul.f32 %v4309_v10, %v4309_v10 }
0x1385   :  { %v4310_v15 = vmul.f32 %v4308_v11, %v4308_v11 }
0x1386   :  { %v4315_v13 = vsel %vm295_vm1, %v4311_v12, 0.0 }
0x1387   :  { %4316 = vadd.xlane.f32.xlu1 %v4315_v13  ;;  %v4312_v14 = vsel %vm295_vm1, %v4310_v15, 0.0 }
0x1388   :  { %4313 = vadd.xlane.f32.xlu0 %v4312_v14 }
0x1414   :  { %v4317_v0 = vpop.xlane.xlu1 %4316 }
0x1415   :  { %v4319_v16 = vmul.f32 0.03125, %v4317_v0  ;;  %v4314_v17 = vpop.xlane.xlu0 %4313 }
0x1416   :  { %v4318_v18 = vmul.f32 0.03125, %v4314_v17 }
0x1417   :  { %v4321_v23 = vadd.f32 1e-05, %v4319_v16 }
0x1418   :  { %v4320_v19 = vadd.f32 1e-05, %v4318_v18 }
0x1419   :  { %5388 = vrsqrt.f32 %v4321_v23 }
0x141a   :  { %5390 = vrsqrt.f32 %v4320_v19 }
0x1423   :  { %v5389_v20 = vpop.eup %5388 }
0x1424   :  { %v5391_v22 = vpop.eup %5390  ;;  %v4325_v28 = vmul.f32 %v5389_v20, %v4309_v10 }
0x1425   :  { %v4324_v46 = vmul.f32 %v5391_v22, %v4308_v11 }
0x1426   :  { %v4333_v24 = vmul.f32 %v4649_v21, %v4325_v28 }
0x1427   :  { %v4332_v26 = vmul.f32 %v4649_v21, %v4324_v46 }
0x1428   :  { %v4341_v25 = vadd.f32 %v4650_v45, %v4333_v24 }
0x1429   :  { %v4340_v29 = vadd.f32 %v4650_v45, %v4332_v26 }
0x142b   :  { %v5285_v32 = vpack.c.bf16 %v4341_v25, %v4340_v29 }
0x142d   :  { %5286 = vmatpush3.bf16.msra.mxu0 %v5285_v32 }
0x142e   :  { %5287 = vmatprep.subr.bf16.mxu0 %v5665_v1 }
0x1430   :  { %5147 = vmatmul.mubr.msk.f32.vlgmr.msra.gmra.mrb[48].mxu0 %vm200_vm0, %v4342_v27 }
0x1431   :  { %5289 = vmatpush3.bf16.msra.mxu0 %v5288_v34  ;;  %5157 = vmatprep.mubr.msk.f32.mxu0 %vm5663_vm2, %v5662_v33 }
0x1432   :  { %5290 = vmatprep.subr.bf16.mxu0 %v5665_v1 }
0x1435   :  { %5292 = vmatpush3.bf16.msra.mxu0 %v5291_v37 }
0x1503   :  { %v4412_v56 = vpop.f32.mrb[48].mxu0 }
0x1504   :  { %v5148_v57 = vpop.f32.mrb[49].mxu0  ;;  %5158 = vmatmul.mubr.msk.f32.vlgmr.msra.gmra.mrb[50].mxu0 %vm295_vm1, %v4412_v56 }
0x15d7   :  { %v4496_v39 = vpop.f32.mrb[50].mxu0 }
0x15d8   :  { %v4497_v3 = vadd.f32 %v4652_v38, %v4496_v39  ;;  %v5159_v40 = vpop.f32.mrb[51].mxu0 }
0x15da   :  { %4500 = vst [vmem:[#allocation19] sm:$0x3] %v4497_v3 }
0x15db   :  { %5623 = shalt.err (!%p5620_p0)
}
0x15dc   :  { %s5624_s20 = scalar_lea.hbm %s6471_s17, 32 }
0x15dd   :  { %p5625_p1 = scmp.ne.s32.totalorder %s6471_s17, %s5624_s20  ;;  %p5628_p2 = scmp.lt.u32.totalorder %s5624_s20, %s6471_s17 }
0x15df   :  { %p5630_p3 = pnand %p5628_p2, %p5625_p1 }
0x15e1   :  { %5633 = shalt.err (!%p5630_p3)
}
0x15e2   :  { %4510 = dma.vmem_to_hbm [thread:$0]  %s4508_s22, 32, %s6471_s17, [#allocation4]  }
0x15e3   :  { %5646 = dma.done.wait [#allocation4], 32  }
0x15e4   :  { %5647 = vsyncadd [#allocation4], 4294967264 }
0x15e5   :  { %4514 = vsyncpa [#allocation3], 1 }
0x15e6   :  { %4515 = vsyncpa [#allocation6], 1 }
0x15e7   :  { %4516 = vsyncpa [#allocation9], 1 }
0x15e8   :  { %4517 = vsyncpa [#allocation12], 1 }
0x15e9   :  { %4518 = vsyncpa [#allocation15], 1 }
0x15ea   :  { %4519 = vsyncpa [#allocation18], 1 }
0x15eb   :  { %4520 = vsyncpa [#allocation4], 1 }

</bundles_post_ra>
